<compile_context>
chip_gen: v5e
topology: v5e:2x2
jax: 0.10.0
libtpu: 0.0.40
codegen_flags: <defaults>
</compile_context>

<pallas_src>
import functools

import jax
import jax.numpy as jnp
from jax.experimental import pallas as pl
from jax.experimental.pallas import tpu as pltpu


# -------------------- fused TextCNN + attention-scorer kernel --------------------

def _textcnn_scorer_kernel(x_ref, other_ref, cw_ref, cb_ref,
                           w1f_ref, w1o_ref, b1_ref, w2_ref,
                           feat_ref, score_ref):
    # x_ref:     (N, Lp, K*E)  im2col'd word-embedded reviews (one side)
    # other_ref: (N, C)        other-side id embeddings
    # cw_ref:    (1, K*E, C)   conv weight in im2col layout
    # cb_ref:    (1, 1, C)     conv bias
    # w1f_ref:   (1, C, C)     scorer Linear1 rows acting on conv features
    # w1o_ref:   (1, C, C)     scorer Linear1 rows acting on other embedding
    # b1_ref:    (1, 1, C)     scorer Linear1 bias
    # w2_ref:    (1, 1, C)     scorer Linear2 weight (C -> 1) as a row
    # feat_ref:  (N, C)        conv features out
    # score_ref: (N, 1)        raw attention scores out (without b2)
    N, Lp, KE = x_ref.shape
    C = cw_ref.shape[2]

    # TextCNN: one big matmul over all review rows and all time positions,
    # bias + ReLU, then max-pool over time (padded windows are duplicates).
    x2d = x_ref[...].reshape(N * Lp, KE)
    y = jnp.dot(x2d, cw_ref[0], preferred_element_type=jnp.float32)     # (N*Lp, C)
    y = jnp.maximum(y + cb_ref[0], 0.0)
    feat = jnp.max(y.reshape(N, Lp, C), axis=1)                         # (N, C)
    feat_ref[...] = feat

    # Attention scorer: Linear(2C->C) split over the concat halves, ReLU,
    # Linear(C->1) as a VPU/XLU lane reduction (no 1-column MXU matmul).
    h = (jnp.dot(feat, w1f_ref[0], preferred_element_type=jnp.float32)
         + jnp.dot(other_ref[...], w1o_ref[0], preferred_element_type=jnp.float32)
         + b1_ref[0])
    h = jnp.maximum(h, 0.0)
    score_ref[...] = jnp.sum(h * w2_ref[0], axis=-1, keepdims=True)     # (N, 1)


def fused_textcnn_scorer(x_all, other_all, cw_all, cb_all,
                         w1f_all, w1o_all, b1_all, w2_all):
    """x_all: (2N, Lp, K*E), other_all: (2N, C); per-side weights stacked on dim 0.

    Returns (feat_all (2N, C), score_all (2N, 1)). Grid step 0 = user side,
    step 1 = item side.
    """
    two_n, Lp, KE = x_all.shape
    N = two_n // 2
    C = other_all.shape[1]
    feat, score = pl.pallas_call(
        _textcnn_scorer_kernel,
        out_shape=(jax.ShapeDtypeStruct((2 * N, C), jnp.float32),
                   jax.ShapeDtypeStruct((2 * N, 1), jnp.float32)),
        grid=(2,),
        in_specs=[
            pl.BlockSpec((N, Lp, KE), lambda s: (s, 0, 0)),
            pl.BlockSpec((N, C), lambda s: (s, 0)),
            pl.BlockSpec((1, KE, C), lambda s: (s, 0, 0)),
            pl.BlockSpec((1, 1, C), lambda s: (s, 0, 0)),
            pl.BlockSpec((1, C, C), lambda s: (s, 0, 0)),
            pl.BlockSpec((1, C, C), lambda s: (s, 0, 0)),
            pl.BlockSpec((1, 1, C), lambda s: (s, 0, 0)),
            pl.BlockSpec((1, 1, C), lambda s: (s, 0, 0)),
        ],
        out_specs=[pl.BlockSpec((N, C), lambda s: (s, 0)),
                   pl.BlockSpec((N, 1), lambda s: (s, 0))],
        compiler_params=pltpu.CompilerParams(dimension_semantics=("parallel",)),
    )(x_all, other_all, cw_all, cb_all, w1f_all, w1o_all, b1_all, w2_all)
    return feat, score


# ------------------------- fused pooling + head kernel -------------------------

def _final_kernel(au_ref, fu_ref, ai_ref, fi_ref, uid_ref, iid_ref,
                  w1_ref, b1_ref, w2_ref, o_ref):
    # Attention-weighted pooling over R reviews, id-embedding add, elementwise
    # product, Linear(C->C) + ReLU, Linear(C->1) as a lane reduction.
    u = jnp.sum(au_ref[...][:, :, None] * fu_ref[...], axis=1) + uid_ref[...]
    it = jnp.sum(ai_ref[...][:, :, None] * fi_ref[...], axis=1) + iid_ref[...]
    cat = u * it                                  # NARRE uses elementwise product
    h = jnp.maximum(jnp.dot(cat, w1_ref[...], preferred_element_type=jnp.float32)
                    + b1_ref[...], 0.0)
    o_ref[...] = jnp.sum(h * w2_ref[...], axis=-1, keepdims=True)


def final_head(a_u, u_feat, a_i, i_feat, uid_emb, iid_emb, w1, b1, w2):
    B, C = uid_emb.shape
    vmem = functools.partial(pl.BlockSpec, memory_space=pltpu.MemorySpace.VMEM)
    out = pl.pallas_call(
        _final_kernel,
        out_shape=jax.ShapeDtypeStruct((B, 1), jnp.float32),
        in_specs=[vmem()] * 9,
        out_specs=vmem(),
    )(a_u, u_feat, a_i, i_feat, uid_emb, iid_emb, w1, b1.reshape(1, -1),
      w2.reshape(1, -1))
    return out[:, 0]


# ------------------------------ glue (plain JAX) ------------------------------

def im2col_reviews(words, K):
    """(N, L, E) -> (N, Lp, K*E), Lp = Lout rounded up to a multiple of 8.

    Padded windows duplicate the last real window so the max-pool is unchanged.
    """
    N, L, E = words.shape
    Lout = L - K + 1
    Lp = ((Lout + 7) // 8) * 8
    starts = jnp.minimum(jnp.arange(Lp), Lout - 1)          # (Lp,)
    idx = starts[:, None] + jnp.arange(K)[None, :]          # (Lp, K)
    patches = words[:, idx, :]                              # (N, Lp, K, E)
    return patches.reshape(N, Lp, K * E)


def attention_weights(scores_raw, threshold, R):
    """softmax + quantile thresholding + renormalization (matches torch code)."""
    # TODO(synk): quantile/threshold renorm stays in plain JAX (tiny (B, R) data;
    # no clean sort/quantile primitive inside a Mosaic kernel).
    scores = jax.nn.softmax(scores_raw, axis=-1)
    thr = jnp.quantile(scores, threshold, axis=1, keepdims=True)
    new_scores = jnp.where(scores > thr, scores, 0.0)       # F.threshold(., thr, 0)
    row_sum = jnp.sum(new_scores, axis=1, keepdims=True)
    new_scores = jnp.where(row_sum == 0.0, new_scores + 1.0 / R, new_scores)
    return new_scores / jnp.sum(new_scores, axis=1, keepdims=True)


def narre_forward(params, data, hyper):
    users_who_reviewed, reviewed_items, user_reviews, item_reviews, user_id, item_id = data
    B = user_id.shape[0]
    R = user_reviews.shape[1]
    L = user_reviews.shape[2]
    C = hyper["latent_size"]
    K = params["user_conv_w"].shape[0]
    N = B * R

    user_bias = params["user_bias"][user_id]                 # gathers: glue
    item_bias = params["item_bias"][item_id]
    u_words = jnp.take(params["word2vec"], user_reviews.reshape(N, L), axis=0)
    i_words = jnp.take(params["word2vec"], item_reviews.reshape(N, L), axis=0)
    reviewed_items_emb = jnp.take(params["item_embedding"],
                                  reviewed_items.reshape(N), axis=0)       # (N, C)
    users_who_reviewed_emb = jnp.take(params["user_embedding"],
                                      users_who_reviewed.reshape(N), axis=0)

    # im2col so each side's TextCNN is one big matmul inside the kernel.
    x_u = im2col_reviews(u_words, K)                         # (N, Lp, K*E)
    x_i = im2col_reviews(i_words, K)
    x_all = jnp.concatenate([x_u, x_i], axis=0)              # (2N, Lp, K*E)
    other_all = jnp.concatenate([reviewed_items_emb, users_who_reviewed_emb], axis=0)

    KE = x_all.shape[-1]
    cw_all = jnp.stack([params["user_conv_w"].reshape(KE, C),
                        params["item_conv_w"].reshape(KE, C)], axis=0)     # (2, KE, C)
    cb_all = jnp.stack([params["user_conv_b"], params["item_conv_b"]],
                       axis=0)[:, None, :]                                  # (2, 1, C)
    w1f_all = jnp.stack([params["att_u_w1"][:C], params["att_i_w1"][:C]], axis=0)
    w1o_all = jnp.stack([params["att_u_w1"][C:], params["att_i_w1"][C:]], axis=0)
    b1_all = jnp.stack([params["att_u_b1"], params["att_i_b1"]], axis=0)[:, None, :]
    w2_all = jnp.stack([params["att_u_w2"][:, 0], params["att_i_w2"][:, 0]],
                       axis=0)[:, None, :]                                  # (2, 1, C)

    feat_all, score_all = fused_textcnn_scorer(
        x_all, other_all, cw_all, cb_all, w1f_all, w1o_all, b1_all, w2_all)

    u_feat = feat_all[:N].reshape(B, R, C)
    i_feat = feat_all[N:].reshape(B, R, C)
    # scorer b2 folded here (tiny scalar; added before softmax as in the reference)
    s_u = score_all[:N].reshape(B, R) + params["att_u_b2"][0]
    s_i = score_all[N:].reshape(B, R) + params["att_i_b2"][0]

    a_u = attention_weights(s_u, hyper["user_threshold"], R)
    a_i = attention_weights(s_i, hyper["item_threshold"], R)

    # Dropout on id embeddings: identity at eval
    uid_emb = jnp.take(params["user_embedding"], user_id, axis=0)
    iid_emb = jnp.take(params["item_embedding"], item_id, axis=0)

    r = final_head(a_u, u_feat, a_i, i_feat, uid_emb, iid_emb,
                   params["final_w1"], params["final_b1"], params["final_w2"])
    # final b2 + user/item/global biases folded in the wrapper (tiny scalars)
    rating = (r + params["final_b2"][0] + user_bias + item_bias
              + params["global_bias"][0])
    return rating                                            # final_shape = (B,)


# ----------------------------------- main -----------------------------------

def init_params(key, hyper, vocab, E, K):
    C = hyper["latent_size"]
    nU = hyper["total_users"] + 2
    nI = hyper["total_items"] + 2
    ks = jax.random.split(key, 20)
    n = lambda k, s: (0.1 * jax.random.normal(k, s)).astype(jnp.float32)
    return {
        "word2vec": n(ks[0], (vocab, E)),
        "user_embedding": n(ks[1], (nU, C)),
        "item_embedding": n(ks[2], (nI, C)),
        "user_conv_w": n(ks[3], (K, E, C)), "user_conv_b": n(ks[4], (C,)),
        "item_conv_w": n(ks[5], (K, E, C)), "item_conv_b": n(ks[6], (C,)),
        "att_u_w1": n(ks[7], (2 * C, C)), "att_u_b1": n(ks[8], (C,)),
        "att_u_w2": n(ks[9], (C, 1)), "att_u_b2": n(ks[10], (1,)),
        "att_i_w1": n(ks[11], (2 * C, C)), "att_i_b1": n(ks[12], (C,)),
        "att_i_w2": n(ks[13], (C, 1)), "att_i_b2": n(ks[14], (1,)),
        "final_w1": n(ks[15], (C, C)), "final_b1": n(ks[16], (C,)),
        "final_w2": n(ks[17], (C, 1)), "final_b2": n(ks[18], (1,)),
        "user_bias": jnp.full((nU,), 0.1, jnp.float32),
        "item_bias": jnp.full((nI,), 0.1, jnp.float32),
        "global_bias": jnp.array([4.0], jnp.float32),
    }


if __name__ == "__main__":
    hyper = dict(total_users=50, total_items=60, latent_size=32,
                 dropout=0.2, user_threshold=0.4, item_threshold=0.4)
    B, R, L, E, K, vocab = 4, 10, 16, 32, 3, 300   # R=10 matches torch hard-coding

    key = jax.random.PRNGKey(0)
    kp, k1, k2, k3, k4, k5, k6 = jax.random.split(key, 7)
    params = init_params(kp, hyper, vocab, E, K)

    users_who_reviewed = jax.random.randint(k1, (B, R), 0, hyper["total_users"] + 2)
    reviewed_items = jax.random.randint(k2, (B, R), 0, hyper["total_items"] + 2)
    user_reviews = jax.random.randint(k3, (B, R, L), 0, vocab)
    item_reviews = jax.random.randint(k4, (B, R, L), 0, vocab)
    user_id = jax.random.randint(k5, (B,), 0, hyper["total_users"] + 2)
    item_id = jax.random.randint(k6, (B,), 0, hyper["total_items"] + 2)

    data = (users_who_reviewed, reviewed_items, user_reviews, item_reviews,
            user_id, item_id)

    rating = narre_forward(params, data, hyper)
    rating = jax.block_until_ready(rating)
    assert rating.shape == (B,) and rating.dtype == jnp.float32
    print("KERNEL_OK")
</pallas_src>

<mosaic_0001>
module attributes {stable_mosaic.version = 11 : i64} {
  func.func @_textcnn_scorer_kernel(%arg0: i32, %arg1: memref<40x16x96xf32, #tpu.memory_space<vmem>>, %arg2: memref<40x32xf32, #tpu.memory_space<vmem>>, %arg3: memref<1x96x32xf32, #tpu.memory_space<vmem>>, %arg4: memref<1x1x32xf32, #tpu.memory_space<vmem>>, %arg5: memref<1x32x32xf32, #tpu.memory_space<vmem>>, %arg6: memref<1x32x32xf32, #tpu.memory_space<vmem>>, %arg7: memref<1x1x32xf32, #tpu.memory_space<vmem>>, %arg8: memref<1x1x32xf32, #tpu.memory_space<vmem>>, %arg9: memref<40x32xf32, #tpu.memory_space<vmem>>, %arg10: memref<40x1xf32, #tpu.memory_space<vmem>>) attributes {dimension_semantics = [#tpu.dimension_semantics<parallel>], iteration_bounds = array<i64: 2>, scalar_prefetch = 0 : i64, scratch_operands = 0 : i64, tpu.core_type = #tpu.core_type<tc>, window_params = [{transform_indices = @transform_0, window_bounds = array<i64: 40, 16, 96>}, {transform_indices = @transform_1, window_bounds = array<i64: 40, 32>}, {transform_indices = @transform_2, window_bounds = array<i64: 1, 96, 32>}, {transform_indices = @transform_3, window_bounds = array<i64: 1, 1, 32>}, {transform_indices = @transform_4, window_bounds = array<i64: 1, 32, 32>}, {transform_indices = @transform_5, window_bounds = array<i64: 1, 32, 32>}, {transform_indices = @transform_6, window_bounds = array<i64: 1, 1, 32>}, {transform_indices = @transform_7, window_bounds = array<i64: 1, 1, 32>}, {transform_indices = @transform_8, window_bounds = array<i64: 40, 32>}, {transform_indices = @transform_9, window_bounds = array<i64: 40, 1>}]} {
    %c0 = arith.constant 0 : index
    %c0_0 = arith.constant 0 : index
    %c0_1 = arith.constant 0 : index
    %0 = vector.load %arg1[%c0, %c0_0, %c0_1] : memref<40x16x96xf32, #tpu.memory_space<vmem>>, vector<40x16x96xf32>
    %1 = vector.shape_cast %0 : vector<40x16x96xf32> to vector<640x96xf32>
    %c0_2 = arith.constant 0 : index
    %c0_3 = arith.constant 0 : index
    %c0_4 = arith.constant 0 : index
    %2 = vector.load %arg3[%c0_2, %c0_3, %c0_4] : memref<1x96x32xf32, #tpu.memory_space<vmem>>, vector<1x96x32xf32>
    %3 = vector.shape_cast %2 : vector<1x96x32xf32> to vector<96x32xf32>
    %cst = arith.constant dense<0.000000e+00> : vector<640x32xf32>
    %4 = tpu.matmul %1, %3, %cst {dimension_numbers = #tpu.dot_dimension_numbers<[1], [0], [0], [1], [0, 0, 1, 1], [], []>} : vector<640x96xf32>, vector<96x32xf32>, vector<640x32xf32> -> vector<640x32xf32>
    %c0_5 = arith.constant 0 : index
    %c0_6 = arith.constant 0 : index
    %c0_7 = arith.constant 0 : index
    %5 = vector.load %arg4[%c0_5, %c0_6, %c0_7] : memref<1x1x32xf32, #tpu.memory_space<vmem>>, vector<1x1x32xf32>
    %6 = vector.shape_cast %5 : vector<1x1x32xf32> to vector<1x32xf32>
    %7 = vector.broadcast %6 : vector<1x32xf32> to vector<640x32xf32>
    %8 = arith.addf %4, %7 : vector<640x32xf32>
    %cst_8 = arith.constant 0.000000e+00 : f32
    %9 = vector.broadcast %cst_8 : f32 to vector<640x32xf32>
    %10 = arith.maximumf %8, %9 : vector<640x32xf32>
    %11 = vector.shape_cast %10 : vector<640x32xf32> to vector<40x16x32xf32>
    %cst_9 = arith.constant dense<0xFF800000> : vector<40x32xf32>
    %12 = vector.multi_reduction <maximumf>, %11, %cst_9 [1] : vector<40x16x32xf32> to vector<40x32xf32>
    %c0_10 = arith.constant 0 : index
    %c0_11 = arith.constant 0 : index
    %13 = vector.load %arg9[%c0_10, %c0_11] : memref<40x32xf32, #tpu.memory_space<vmem>>, vector<40x32xf32>
    tpu.vector_store %arg9[%c0_10, %c0_11], %12 {strides = array<i32>} : memref<40x32xf32, #tpu.memory_space<vmem>>, vector<40x32xf32>,
    %c0_12 = arith.constant 0 : index
    %c0_13 = arith.constant 0 : index
    %c0_14 = arith.constant 0 : index
    %14 = vector.load %arg5[%c0_12, %c0_13, %c0_14] : memref<1x32x32xf32, #tpu.memory_space<vmem>>, vector<1x32x32xf32>
    %15 = vector.shape_cast %14 : vector<1x32x32xf32> to vector<32x32xf32>
    %cst_15 = arith.constant dense<0.000000e+00> : vector<40x32xf32>
    %16 = tpu.matmul %12, %15, %cst_15 {dimension_numbers = #tpu.dot_dimension_numbers<[1], [0], [0], [1], [0, 0, 1, 1], [], []>} : vector<40x32xf32>, vector<32x32xf32>, vector<40x32xf32> -> vector<40x32xf32>
    %c0_16 = arith.constant 0 : index
    %c0_17 = arith.constant 0 : index
    %17 = vector.load %arg2[%c0_16, %c0_17] : memref<40x32xf32, #tpu.memory_space<vmem>>, vector<40x32xf32>
    %c0_18 = arith.constant 0 : index
    %c0_19 = arith.constant 0 : index
    %c0_20 = arith.constant 0 : index
    %18 = vector.load %arg6[%c0_18, %c0_19, %c0_20] : memref<1x32x32xf32, #tpu.memory_space<vmem>>, vector<1x32x32xf32>
    %19 = vector.shape_cast %18 : vector<1x32x32xf32> to vector<32x32xf32>
    %cst_21 = arith.constant dense<0.000000e+00> : vector<40x32xf32>
    %20 = tpu.matmul %17, %19, %cst_21 {dimension_numbers = #tpu.dot_dimension_numbers<[1], [0], [0], [1], [0, 0, 1, 1], [], []>} : vector<40x32xf32>, vector<32x32xf32>, vector<40x32xf32> -> vector<40x32xf32>
    %21 = arith.addf %16, %20 : vector<40x32xf32>
    %c0_22 = arith.constant 0 : index
    %c0_23 = arith.constant 0 : index
    %c0_24 = arith.constant 0 : index
    %22 = vector.load %arg7[%c0_22, %c0_23, %c0_24] : memref<1x1x32xf32, #tpu.memory_space<vmem>>, vector<1x1x32xf32>
    %23 = vector.shape_cast %22 : vector<1x1x32xf32> to vector<1x32xf32>
    %24 = vector.broadcast %23 : vector<1x32xf32> to vector<40x32xf32>
    %25 = arith.addf %21, %24 : vector<40x32xf32>
    %cst_25 = arith.constant 0.000000e+00 : f32
    %26 = vector.broadcast %cst_25 : f32 to vector<40x32xf32>
    %27 = arith.maximumf %25, %26 : vector<40x32xf32>
    %c0_26 = arith.constant 0 : index
    %c0_27 = arith.constant 0 : index
    %c0_28 = arith.constant 0 : index
    %28 = vector.load %arg8[%c0_26, %c0_27, %c0_28] : memref<1x1x32xf32, #tpu.memory_space<vmem>>, vector<1x1x32xf32>
    %29 = vector.shape_cast %28 : vector<1x1x32xf32> to vector<1x32xf32>
    %30 = vector.broadcast %29 : vector<1x32xf32> to vector<40x32xf32>
    %31 = arith.mulf %27, %30 : vector<40x32xf32>
    %cst_29 = arith.constant dense<0.000000e+00> : vector<40xf32>
    %32 = vector.multi_reduction <add>, %31, %cst_29 [1] : vector<40x32xf32> to vector<40xf32>
    %33 = vector.shape_cast %32 : vector<40xf32> to vector<40x1xf32>
    %c0_30 = arith.constant 0 : index
    %c0_31 = arith.constant 0 : index
    %34 = vector.load %arg10[%c0_30, %c0_31] : memref<40x1xf32, #tpu.memory_space<vmem>>, vector<40x1xf32>
    tpu.vector_store %arg10[%c0_30, %c0_31], %33 {strides = array<i32>} : memref<40x1xf32, #tpu.memory_space<vmem>>, vector<40x1xf32>,
    return
  }
  func.func @transform_0(%arg0: i32) -> (i32, i32, i32) {
    %c0_i32 = arith.constant 0 : i32
    %c0_i32_0 = arith.constant 0 : i32
    %c0_i32_1 = arith.constant 0 : i32
    return %arg0, %c0_i32, %c0_i32_0 : i32, i32, i32
  }
  func.func @transform_1(%arg0: i32) -> (i32, i32) {
    %c0_i32 = arith.constant 0 : i32
    %c0_i32_0 = arith.constant 0 : i32
    return %arg0, %c0_i32 : i32, i32
  }
  func.func @transform_2(%arg0: i32) -> (i32, i32, i32) {
    %c0_i32 = arith.constant 0 : i32
    %c0_i32_0 = arith.constant 0 : i32
    %c0_i32_1 = arith.constant 0 : i32
    return %arg0, %c0_i32, %c0_i32_0 : i32, i32, i32
  }
  func.func @transform_3(%arg0: i32) -> (i32, i32, i32) {
    %c0_i32 = arith.constant 0 : i32
    %c0_i32_0 = arith.constant 0 : i32
    %c0_i32_1 = arith.constant 0 : i32
    return %arg0, %c0_i32, %c0_i32_0 : i32, i32, i32
  }
  func.func @transform_4(%arg0: i32) -> (i32, i32, i32) {
    %c0_i32 = arith.constant 0 : i32
    %c0_i32_0 = arith.constant 0 : i32
    %c0_i32_1 = arith.constant 0 : i32
    return %arg0, %c0_i32, %c0_i32_0 : i32, i32, i32
  }
  func.func @transform_5(%arg0: i32) -> (i32, i32, i32) {
    %c0_i32 = arith.constant 0 : i32
    %c0_i32_0 = arith.constant 0 : i32
    %c0_i32_1 = arith.constant 0 : i32
    return %arg0, %c0_i32, %c0_i32_0 : i32, i32, i32
  }
  func.func @transform_6(%arg0: i32) -> (i32, i32, i32) {
    %c0_i32 = arith.constant 0 : i32
    %c0_i32_0 = arith.constant 0 : i32
    %c0_i32_1 = arith.constant 0 : i32
    return %arg0, %c0_i32, %c0_i32_0 : i32, i32, i32
  }
  func.func @transform_7(%arg0: i32) -> (i32, i32, i32) {
    %c0_i32 = arith.constant 0 : i32
    %c0_i32_0 = arith.constant 0 : i32
    %c0_i32_1 = arith.constant 0 : i32
    return %arg0, %c0_i32, %c0_i32_0 : i32, i32, i32
  }
  func.func @transform_8(%arg0: i32) -> (i32, i32) {
    %c0_i32 = arith.constant 0 : i32
    %c0_i32_0 = arith.constant 0 : i32
    return %arg0, %c0_i32 : i32, i32
  }
  func.func @transform_9(%arg0: i32) -> (i32, i32) {
    %c0_i32 = arith.constant 0 : i32
    %c0_i32_0 = arith.constant 0 : i32
    return %arg0, %c0_i32 : i32, i32
  }
}

</mosaic_0001>

<bundles_post_ra>
// kernel: tpu_custom_call.1
= control target key start
LH: loop header
LB: loop body
LE: loop exit
PB: predicated region body
PF: predicated region fallthrough
CT: control target
= control target key end

     0   :  { %15 = vsyncpa [#allocation3], 0  ;;  %s2969_s0 = inlined_call_operand.hbm [shape: f32[80,16,96], index: 0, kind: input, shape index: {}]   ;;  %s2970_s1 = inlined_call_operand.vmem [shape: f32[80,32], index: 1, kind: input, shape index: {}]   ;;  %s2971_s2 = inlined_call_operand.vmem [shape: f32[2,96,32], index: 2, kind: input, shape index: {}]   ;;  %s2972_s3 = inlined_call_operand.vmem [shape: f32[2,1,32], index: 3, kind: input, shape index: {}]   ;;  %s2973_s4 = inlined_call_operand.vmem [shape: f32[2,32,32], index: 4, kind: input, shape index: {}]   ;;  %s2974_s5 = inlined_call_operand.vmem [shape: f32[2,32,32], index: 5, kind: input, shape index: {}]   ;;  %s2975_s6 = inlined_call_operand.vmem [shape: f32[2,1,32], index: 6, kind: input, shape index: {}]   ;;  %s2976_s7 = inlined_call_operand.vmem [shape: f32[2,1,32], index: 7, kind: input, shape index: {}]   ;;  %s2977_s8 = inlined_call_operand.vmem [shape: f32[80,32], index: 8, kind: output, shape index: {0}]   ;;  %s2978_s9 = inlined_call_operand.vmem [shape: f32[80,1], index: 9, kind: output, shape index: {1}]  }
   0x1   :  { %17 = vsyncpa [#allocation3 + $0x1], 0  ;;  %s2259_s30 = smov 0   ;;  %s2261_s10 = smov 0  }
   0x2   :  { %s2263_s11 = smov 0   ;;  %s2265_s12 = smov 0  }
   0x3 LB: > { %s2278_s13 = sadd.s32 4294967295, %s2205_s12   ;;  %s2281_s14 = sadd.s32 1, %s2205_s12   ;;  %s2205_s12 = sphi %s2265_s12, %s2987_s12   ;;  %s2201_s11 = sphi %s2263_s11, %s2986_s11   ;;  %s2197_s10 = sphi %s2261_s10, %s2985_s10   ;;  %s2193_s30 = sphi %s2259_s30, %s2984_s30  }
   0x4   : > { %s27_s15 = ssub.s32 %s2205_s12, %s2281_s14  ;;  %s30_s16 = sadd.s32 1, %s2201_s11 }
   0x5   : > { %p28_p0 = scmp.eq.s32.totalorder %s27_s15, 0  ;;  %p37_p1 = scmp.ne.s32.totalorder %s2201_s11, %s2197_s10 }
   0x6   : > { %p38_p2 = scmp.eq.s32.totalorder %s2205_s12, 0  ;;  %p43_p3 = scmp.ne.s32.totalorder %s2197_s10, %s2193_s30 }
   0x7   : > { %s2291_s17 = scalar_select %p28_p0, %s2201_s11, %s30_s16  }
   0x8   : > { %p39_p4 = por %p38_p2, %p37_p1  ;;  %p44_p5 = scmp.eq.s32.totalorder %s2278_s13, 0 }
   0x9   : > { %2979 = sst [smem:[#allocation5_spill]] %s2291_s17  ;;  %p2102_p6 = scmp.lt.s32.totalorder %s2205_s12, 2 }
   0xa   : > { %p2295_p7 = por %p44_p5, %p43_p3  ;;  %s301_s19 = sand.u32 1, %s2201_s11  }
   0xb   : > { %s2093_s20 = smul.u32 640, %s301_s19  ;;  %p2301_p8 = pnand %p2102_p6, %p39_p4 }
   0xc   : > { %s2056_s21 = smul.u32 640, %s2205_s12  ;;  %p1951_p9 = scmp.ge.s32.totalorder %s2205_s12, 1 }
   0xd   : > { %s305_s26 = scalar_lea.vmem [#allocation2], %s2093_s20  ;;  %s302_s29 = scalar_lea.sflag [#allocation3], %s301_s19 }
   0xe   : > { %s311_s25 = scalar_lea.hbm %s2969_s0, %s2056_s21  ;;  %s314_s27 = sshll.u32 %s305_s26, 4  ;;  %s315_s27 = int_to_ptr.vmem [resolvable:$true] %s314_s27 }
   0xf   : > { %s312_s28 = sshll.u32 %s311_s25, 4  ;;  %p2145_p11 = pneg %p2301_p8  ;;  %s313_s28 = int_to_ptr.hbm [resolvable:$true] %s312_s28 }
  0x10   : > { %s2141_s30 = sshra.s32 %s313_s28, 4  ;;  %s2148_s23 = scalar_lea.hbm %s2969_s0, 1280  ;;  %s2142_s30 = int_to_ptr.hbm [resolvable:$true] %s2141_s30 }
  0x11   : > { %s2143_s15 = scalar_lea.hbm %s2142_s30, 640  ;;  %p2149_p0 = scmp.lt.s32.totalorder %s2142_s30, %s2969_s0 }
  0x12   : > { %p2144_p10 = scmp.ne.s32.totalorder %s2142_s30, %s2143_s15  ;;  %p2150_p1 = scmp.lt.s32.totalorder %s2148_s23, %s2143_s15 }
  0x14   : > { %p2146_p12 = pnand %p2145_p11, %p2144_p10  ;;  %p2151_p2 = por %p2150_p1, %p2149_p0 }
  0x16   : > { %p2147_p13 = pneg %p2146_p12 }
  0x18   : > { %p2152_p3 = pnand %p2151_p2, %p2147_p13 }
  0x1a   : > { %2155 = shalt.err (!%p2152_p3)
}
  0x1b   : > { %s2207_s19 = smov 128   ;;  %s2208_s24 = smov 8  }
  0x1c   : > { %2101 = dma.hbm_to_vmem [thread:$0]  (!%p2301_p8), %s313_s28, 10240, %s315_s27, %s302_s29, %s2207_s19, %s2207_s19, %s2208_s24  }
  0x1d   : > { %p373_p4 = scmp.lt.s32.totalorder %s2205_s12, 3 }
  0x1f   : > { %p374_p5 = pnand %p1951_p9, %p373_p4 }
  0x20   : > { %s379_s17 = sand.u32 (!%p374_p5), 1, %s2197_s10  }
  0x21   : > { %377 = sbr.rel (%p374_p5) target bundleno = 672 (0x2a0), region = 52  ;;  %s380_s26 = scalar_lea.sflag (!%p374_p5), [#allocation3], %s379_s17 }
  0x22   : > { %s2094_s25 = smul.u32 (!%p374_p5), 640, %s379_s17 }
  0x24   : > { %s2323_s30 = scalar_lea.vmem (!%p374_p5), [#allocation2], %s2094_s25 }
  0x26   : > { %2188 = dma.done.wait (%p2295_p7), %s380_s26, 10240  }
  0x27   : > { %2190 = vsyncadd (%p2295_p7), %s380_s26, 4294957056  ;;  %p460_p6 = scmp.lt.s32.totalorder %s2278_s13, 1  ;;  %v496_v12 = vld [vmem:[%s2323_s30] sm:$0xff]  ;;  %vm592_vm0 = vcmask 785408   ;;  %v518_v13 = vld [vmem:[%s2323_s30 + $0xb0] sm:$0xff]  ;;  %vm1170_vm1 = vcmask 261120  }
  0x28   : > { %v536_v14 = vld [vmem:[%s2323_s30 + $0x140] sm:$0xff]  ;;  %v554_v15 = vld [vmem:[%s2323_s30 + $0x1d0] sm:$0xff]  ;;  %v497_v16 = vld [vmem:[%s2323_s30 + $0x8] sm:$0xff]  ;;  %vm1571_vm2 = vcmask 1041409   ;;  %vm1573_vm3 = vcmask 1042434   ;;  %vm1575_vm4 = vcmask 1043459  }
  0x29   : > { %s2331_s22 = scalar_select %p460_p6, %s2278_s13, 1  ;;  %v519_v17 = vld [vmem:[%s2323_s30 + $0xb8] sm:$0xff]  ;;  %v537_v18 = vld [vmem:[%s2323_s30 + $0x148] sm:$0xff]  ;;  %v498_v20 = vld [vmem:[%s2323_s30 + $0x10] sm:$0xff]  ;;  %vm1577_vm5 = vcmask 1044484   ;;  %vm1579_vm6 = vcmask 1045509  }
  0x2a   : > { %v555_v19 = vld [vmem:[%s2323_s30 + $0x1d8] sm:$0xff]  ;;  %v520_v21 = vld [vmem:[%s2323_s30 + $0xc0] sm:$0xff]  ;;  %v538_v22 = vld [vmem:[%s2323_s30 + $0x150] sm:$0xff]  ;;  %s454_s26 = smul.u32 5, %s2278_s13  ;;  %vm1581_vm7 = vcmask 1046534   ;;  %vm1583_vm8 = vcmask 1047559  }
  0x2b   : > { %s2095_s12 = smul.u32 96, %s2331_s22  ;;  %s2343_s18 = scalar_lea.vmem %s2972_s3, %s2331_s22  ;;  %v556_v23 = vld [vmem:[%s2323_s30 + $0x1e0] sm:$0xff]  ;;  %v499_v24 = vld [vmem:[%s2323_s30 + $0x18] sm:$0xff]  ;;  %v521_v25 = vld [vmem:[%s2323_s30 + $0xc8] sm:$0xff]  ;;  %vm1763_vm9 = vcmask 7168  }
  0x2c   : > { %v539_v26 = vld [vmem:[%s2323_s30 + $0x158] sm:$0xff]  ;;  %v557_v27 = vld [vmem:[%s2323_s30 + $0x1e8] sm:$0xff]  ;;  %v500_v28 = vld [vmem:[%s2323_s30 + $0x20] sm:$0xff]  ;;  %s2054_s23 = sshll.u32 %s2331_s22, 5  ;;  %p2682_p7 = scmp.lt.s32.totalorder %s454_s26, 9 }
  0x2d   : > { %s2337_s29 = scalar_lea.vmem %s2971_s2, %s2095_s12  ;;  %v522_v29 = vld [vmem:[%s2323_s30 + $0xd0] sm:$0xff]  ;;  %v540_v30 = vld [vmem:[%s2323_s30 + $0x160] sm:$0xff]  ;;  %v501_v32 = vld [vmem:[%s2323_s30 + $0x28] sm:$0xff]  ;;  %s2542_s19 = scalar_lea.vmem %s2973_s4, %s2054_s23 }
  0x2e   : > { %v587_v0 = vld [vmem:[%s2337_s29 + $0x58] sm:$0xff]  ;;  %v586_v1 = vld [vmem:[%s2337_s29 + $0x50] sm:$0xff]  ;;  %v585_v2 = vld [vmem:[%s2337_s29 + $0x48] sm:$0xff]  ;;  %s2551_s25 = scalar_lea.vmem %s2974_s5, %s2054_s23  ;;  %s2989_s26 = smov (!%p2682_p7, %s454_s26), 9 }
  0x2f   : > { %837 = vmatpush.msra.mxu0 %v587_v0  ;;  %2057 = vmatpush.msra.mxu1 %v587_v0  ;;  %v584_v3 = vld [vmem:[%s2337_s29 + $0x40] sm:$0xff]  ;;  %v583_v4 = vld [vmem:[%s2337_s29 + $0x38] sm:$0xff]  ;;  %v582_v5 = vld [vmem:[%s2337_s29 + $0x30] sm:$0xff]  ;;  %s2715_s13 = sshll.u32 %s2989_s26, 3  ;;  %s480_s16 = scalar_lea.vmem %s2975_s6, %s2331_s22 }
  0x30   : > { %2058 = vmatpush.msra.mxu2 %v587_v0  ;;  %2059 = vmatpush.msra.mxu3 %v587_v0  ;;  %v581_v6 = vld [vmem:[%s2337_s29 + $0x28] sm:$0xff]  ;;  %v580_v7 = vld [vmem:[%s2337_s29 + $0x20] sm:$0xff]  ;;  %v579_v8 = vld [vmem:[%s2337_s29 + $0x18] sm:$0xff]  ;;  %s2723_s28 = scalar_lea.vmem %s2970_s1, %s2715_s13  ;;  %s2809_s20 = scalar_lea.vmem %s2977_s8, %s2715_s13 }
  0x31   : > { %838 = vmatpush.msra.mxu0 %v586_v1  ;;  %2060 = vmatpush.msra.mxu1 %v586_v1  ;;  %v578_v9 = vld [vmem:[%s2337_s29 + $0x10] sm:$0xff]  ;;  %v577_v10 = vld [vmem:[%s2337_s29 + $0x8] sm:$0xff]  ;;  %v576_v11 = vld [vmem:[%s2337_s29] sm:$0xff]  ;;  %s483_s24 = scalar_lea.vmem %s2976_s7, %s2331_s22  ;;  %s494_s27 = scalar_lea.vmem %s2978_s9, %s2715_s13 }
  0x32   : > { %2061 = vmatpush.msra.mxu2 %v586_v1  ;;  %2062 = vmatpush.msra.mxu3 %v586_v1  ;;  %v558_v31 = vld [vmem:[%s2323_s30 + $0x1f0] sm:$0xff]  ;;  %v523_v33 = vld [vmem:[%s2323_s30 + $0xd8] sm:$0xff]  ;;  %v541_v34 = vld [vmem:[%s2323_s30 + $0x168] sm:$0xff] }
  0x33   : > { %839 = vmatpush.msra.mxu0 %v585_v2  ;;  %2063 = vmatpush.msra.mxu1 %v585_v2  ;;  %v559_v35 = vld [vmem:[%s2323_s30 + $0x1f8] sm:$0xff]  ;;  %v502_v36 = vld [vmem:[%s2323_s30 + $0x30] sm:$0xff]  ;;  %v524_v37 = vld [vmem:[%s2323_s30 + $0xe0] sm:$0xff] }
  0x34   : > { %2064 = vmatpush.msra.mxu2 %v585_v2  ;;  %2065 = vmatpush.msra.mxu3 %v585_v2  ;;  %v542_v38 = vld [vmem:[%s2323_s30 + $0x170] sm:$0xff]  ;;  %v560_v39 = vld [vmem:[%s2323_s30 + $0x200] sm:$0xff]  ;;  %v503_v40 = vld [vmem:[%s2323_s30 + $0x38] sm:$0xff] }
  0x35   : > { %840 = vmatpush.msra.mxu0 %v584_v3  ;;  %2066 = vmatpush.msra.mxu1 %v584_v3  ;;  %v525_v41 = vld [vmem:[%s2323_s30 + $0xe8] sm:$0xff]  ;;  %v543_v42 = vld [vmem:[%s2323_s30 + $0x178] sm:$0xff]  ;;  %v504_v44 = vld [vmem:[%s2323_s30 + $0x40] sm:$0xff] }
  0x36   : > { %2067 = vmatpush.msra.mxu2 %v584_v3  ;;  %2068 = vmatpush.msra.mxu3 %v584_v3  ;;  %v561_v43 = vld [vmem:[%s2323_s30 + $0x208] sm:$0xff]  ;;  %v526_v45 = vld [vmem:[%s2323_s30 + $0xf0] sm:$0xff]  ;;  %v544_v46 = vld [vmem:[%s2323_s30 + $0x180] sm:$0xff] }
  0x37   : > { %841 = vmatpush.msra.mxu0 %v583_v4  ;;  %2069 = vmatpush.msra.mxu1 %v583_v4  ;;  %v562_v47 = vld [vmem:[%s2323_s30 + $0x210] sm:$0xff]  ;;  %v505_v48 = vld [vmem:[%s2323_s30 + $0x48] sm:$0xff]  ;;  %v527_v49 = vld [vmem:[%s2323_s30 + $0xf8] sm:$0xff] }
  0x38   : > { %2070 = vmatpush.msra.mxu2 %v583_v4  ;;  %2071 = vmatpush.msra.mxu3 %v583_v4  ;;  %v545_v50 = vld [vmem:[%s2323_s30 + $0x188] sm:$0xff]  ;;  %v563_v51 = vld [vmem:[%s2323_s30 + $0x218] sm:$0xff]  ;;  %v506_v52 = vld [vmem:[%s2323_s30 + $0x50] sm:$0xff] }
  0x39   : > { %842 = vmatpush.msra.mxu0 %v582_v5  ;;  %2072 = vmatpush.msra.mxu1 %v582_v5  ;;  %v528_v53 = vld [vmem:[%s2323_s30 + $0x100] sm:$0xff]  ;;  %v546_v54 = vld [vmem:[%s2323_s30 + $0x190] sm:$0xff]  ;;  %v507_v56 = vld [vmem:[%s2323_s30 + $0x58] sm:$0xff] }
  0x3a   : > { %2073 = vmatpush.msra.mxu2 %v582_v5  ;;  %2074 = vmatpush.msra.mxu3 %v582_v5  ;;  %v564_v55 = vld [vmem:[%s2323_s30 + $0x220] sm:$0xff]  ;;  %v529_v57 = vld [vmem:[%s2323_s30 + $0x108] sm:$0xff]  ;;  %v547_v58 = vld [vmem:[%s2323_s30 + $0x198] sm:$0xff] }
  0x3b   : > { %843 = vmatpush.msra.mxu0 %v581_v6  ;;  %2075 = vmatpush.msra.mxu1 %v581_v6  ;;  %v565_v59 = vld [vmem:[%s2323_s30 + $0x228] sm:$0xff]  ;;  %v508_v60 = vld [vmem:[%s2323_s30 + $0x60] sm:$0xff]  ;;  %v530_v61 = vld [vmem:[%s2323_s30 + $0x110] sm:$0xff] }
  0x3c   : > { %2076 = vmatpush.msra.mxu2 %v581_v6  ;;  %2077 = vmatpush.msra.mxu3 %v581_v6  ;;  %v548_v62 = vld [vmem:[%s2323_s30 + $0x1a0] sm:$0xff]  ;;  %v566_v63 = vld [vmem:[%s2323_s30 + $0x230] sm:$0xff]  ;;  %v509_v0 = vld [vmem:[%s2323_s30 + $0x68] sm:$0xff] }
  0x3d   : > { %844 = vmatpush.msra.mxu0 %v580_v7  ;;  %2078 = vmatpush.msra.mxu1 %v580_v7  ;;  %v531_v1 = vld [vmem:[%s2323_s30 + $0x118] sm:$0xff]  ;;  %v549_v2 = vld [vmem:[%s2323_s30 + $0x1a8] sm:$0xff]  ;;  %v510_v4 = vld [vmem:[%s2323_s30 + $0x70] sm:$0xff] }
  0x3e   : > { %2079 = vmatpush.msra.mxu2 %v580_v7  ;;  %2080 = vmatpush.msra.mxu3 %v580_v7  ;;  %v567_v3 = vld [vmem:[%s2323_s30 + $0x238] sm:$0xff]  ;;  %v532_v5 = vld [vmem:[%s2323_s30 + $0x120] sm:$0xff]  ;;  %v550_v6 = vld [vmem:[%s2323_s30 + $0x1b0] sm:$0xff] }
  0x3f   : > { %845 = vmatpush.msra.mxu0 %v579_v8  ;;  %2081 = vmatpush.msra.mxu1 %v579_v8  ;;  %v568_v7 = vld [vmem:[%s2323_s30 + $0x240] sm:$0xff] }
  0x40   : > { %2082 = vmatpush.msra.mxu2 %v579_v8  ;;  %2083 = vmatpush.msra.mxu3 %v579_v8  ;;  %v511_v8 = vld [vmem:[%s2323_s30 + $0x78] sm:$0xff] }
  0x41   : > { %846 = vmatpush.msra.mxu0 %v578_v9  ;;  %2084 = vmatpush.msra.mxu1 %v578_v9 }
  0x42   : > { %2085 = vmatpush.msra.mxu2 %v578_v9  ;;  %2086 = vmatpush.msra.mxu3 %v578_v9  ;;  %v533_v9 = vld [vmem:[%s2323_s30 + $0x128] sm:$0xff] }
  0x43   : > { %847 = vmatpush.msra.mxu0 %v577_v10  ;;  %2087 = vmatpush.msra.mxu1 %v577_v10 }
  0x44   : > { %2088 = vmatpush.msra.mxu2 %v577_v10  ;;  %2089 = vmatpush.msra.mxu3 %v577_v10  ;;  %v551_v10 = vld [vmem:[%s2323_s30 + $0x1b8] sm:$0xff] }
  0x45   : > { %848 = vmatpush.msra.mxu0 %v576_v11  ;;  %2090 = vmatpush.msra.mxu1 %v576_v11 }
  0x46   : > { %2091 = vmatpush.msra.mxu2 %v576_v11  ;;  %2092 = vmatpush.msra.mxu3 %v576_v11  ;;  %v569_v11 = vld [vmem:[%s2323_s30 + $0x248] sm:$0xff] }
  0x47   : > { %1960 = vmatmul.msk.f32.vlgmr.msra.gmra.mxu0 %vm592_vm0, %v496_v12  ;;  %1982 = vmatmul.msk.f32.vlgmr.msra.gmra.mxu1 %vm592_vm0, %v518_v13  ;;  %v2486_v12 = vld [vmem:[%s2343_s18] ss:$0 sm:$0xff] }
  0x48   : > { %2000 = vmatmul.msk.f32.vlgmr.msra.gmra.mxu2 %vm592_vm0, %v536_v14  ;;  %2018 = vmatmul.msk.f32.vlgmr.msra.gmra.mxu3 %vm592_vm0, %v554_v15  ;;  %v512_v15 = vld [vmem:[%s2323_s30 + $0x80] sm:$0xff] }
  0x4f   : > { %1961 = vmatmul.msk.f32.gmra.mxu0 %vm592_vm0, %v497_v16  ;;  %1983 = vmatmul.msk.f32.gmra.mxu1 %vm592_vm0, %v519_v17  ;;  %v534_v16 = vld [vmem:[%s2323_s30 + $0x130] sm:$0xff] }
  0x50   : > { %2001 = vmatmul.msk.f32.gmra.mxu2 %vm592_vm0, %v537_v18  ;;  %2019 = vmatmul.msk.f32.gmra.mxu3 %vm592_vm0, %v555_v19  ;;  %v552_v19 = vld [vmem:[%s2323_s30 + $0x1c0] sm:$0xff] }
  0x57   : > { %1962 = vmatmul.msk.f32.gmra.mxu0 %vm592_vm0, %v498_v20  ;;  %1984 = vmatmul.msk.f32.gmra.mxu1 %vm592_vm0, %v520_v21  ;;  %v570_v20 = vld [vmem:[%s2323_s30 + $0x250] sm:$0xff] }
  0x58   : > { %2002 = vmatmul.msk.f32.gmra.mxu2 %vm592_vm0, %v538_v22  ;;  %2020 = vmatmul.msk.f32.gmra.mxu3 %vm592_vm0, %v556_v23 }
  0x5f   : > { %1963 = vmatmul.msk.f32.gmra.mxu0 %vm592_vm0, %v499_v24  ;;  %1985 = vmatmul.msk.f32.gmra.mxu1 %vm592_vm0, %v521_v25 }
  0x60   : > { %2003 = vmatmul.msk.f32.gmra.mxu2 %vm592_vm0, %v539_v26  ;;  %2021 = vmatmul.msk.f32.gmra.mxu3 %vm592_vm0, %v557_v27 }
  0x67   : > { %1964 = vmatmul.msk.f32.gmra.mxu0 %vm592_vm0, %v500_v28  ;;  %1986 = vmatmul.msk.f32.gmra.mxu1 %vm592_vm0, %v522_v29  ;;  %v513_v28 = vld [vmem:[%s2323_s30 + $0x88] sm:$0xff]  ;;  %v535_v29 = vld [vmem:[%s2323_s30 + $0x138] sm:$0xff] }
  0x68   : > { %2004 = vmatmul.msk.f32.gmra.mxu2 %vm592_vm0, %v540_v30  ;;  %2022 = vmatmul.msk.f32.gmra.mxu3 %vm592_vm0, %v558_v31 }
  0x6f   : > { %1965 = vmatmul.msk.f32.gmra.mxu0 %vm592_vm0, %v501_v32  ;;  %1987 = vmatmul.msk.f32.gmra.mxu1 %vm592_vm0, %v523_v33  ;;  %v553_v33 = vld [vmem:[%s2323_s30 + $0x1c8] sm:$0xff] }
  0x70   : > { %2005 = vmatmul.msk.f32.gmra.mxu2 %vm592_vm0, %v541_v34  ;;  %2023 = vmatmul.msk.f32.gmra.mxu3 %vm592_vm0, %v559_v35  ;;  %v571_v34 = vld [vmem:[%s2323_s30 + $0x258] sm:$0xff] }
  0x77   : > { %1966 = vmatmul.msk.f32.gmra.mxu0 %vm592_vm0, %v502_v36  ;;  %1988 = vmatmul.msk.f32.gmra.mxu1 %vm592_vm0, %v524_v37 }
  0x78   : > { %2006 = vmatmul.msk.f32.gmra.mxu2 %vm592_vm0, %v542_v38  ;;  %2024 = vmatmul.msk.f32.gmra.mxu3 %vm592_vm0, %v560_v39 }
  0x7f   : > { %1967 = vmatmul.msk.f32.gmra.mxu0 %vm592_vm0, %v503_v40  ;;  %1989 = vmatmul.msk.f32.gmra.mxu1 %vm592_vm0, %v525_v41 }
  0x80   : > { %2007 = vmatmul.msk.f32.gmra.mxu2 %vm592_vm0, %v543_v42  ;;  %2025 = vmatmul.msk.f32.gmra.mxu3 %vm592_vm0, %v561_v43 }
  0x87   : > { %1968 = vmatmul.msk.f32.gmra.mxu0 %vm592_vm0, %v504_v44  ;;  %1990 = vmatmul.msk.f32.gmra.mxu1 %vm592_vm0, %v526_v45 }
  0x88   : > { %2008 = vmatmul.msk.f32.gmra.mxu2 %vm592_vm0, %v544_v46  ;;  %2026 = vmatmul.msk.f32.gmra.mxu3 %vm592_vm0, %v562_v47 }
  0x8f   : > { %1969 = vmatmul.msk.f32.gmra.mxu0 %vm592_vm0, %v505_v48  ;;  %1991 = vmatmul.msk.f32.gmra.mxu1 %vm592_vm0, %v527_v49 }
  0x90   : > { %2009 = vmatmul.msk.f32.gmra.mxu2 %vm592_vm0, %v545_v50  ;;  %2027 = vmatmul.msk.f32.gmra.mxu3 %vm592_vm0, %v563_v51  ;;  %v514_v51 = vld [vmem:[%s2323_s30 + $0x90] sm:$0xff] }
  0x97   : > { %1970 = vmatmul.msk.f32.gmra.mxu0 %vm592_vm0, %v506_v52  ;;  %1992 = vmatmul.msk.f32.gmra.mxu1 %vm592_vm0, %v528_v53 }
  0x98   : > { %2010 = vmatmul.msk.f32.gmra.mxu2 %vm592_vm0, %v546_v54  ;;  %2028 = vmatmul.msk.f32.gmra.mxu3 %vm592_vm0, %v564_v55  ;;  %v572_v54 = vld [vmem:[%s2323_s30 + $0x260] sm:$0xff] }
  0x9f   : > { %1971 = vmatmul.msk.f32.gmra.mxu0 %vm592_vm0, %v507_v56  ;;  %1993 = vmatmul.msk.f32.gmra.mxu1 %vm592_vm0, %v529_v57 }
  0xa0   : > { %2011 = vmatmul.msk.f32.gmra.mxu2 %vm592_vm0, %v547_v58  ;;  %2029 = vmatmul.msk.f32.gmra.mxu3 %vm592_vm0, %v565_v59 }
  0xa7   : > { %1972 = vmatmul.msk.f32.gmra.mxu0 %vm592_vm0, %v508_v60  ;;  %1994 = vmatmul.msk.f32.gmra.mxu1 %vm592_vm0, %v530_v61 }
  0xa8   : > { %2012 = vmatmul.msk.f32.gmra.mxu2 %vm592_vm0, %v548_v62  ;;  %2030 = vmatmul.msk.f32.gmra.mxu3 %vm592_vm0, %v566_v63 }
  0xaf   : > { %1973 = vmatmul.msk.f32.gmra.mxu0 %vm592_vm0, %v509_v0  ;;  %1995 = vmatmul.msk.f32.gmra.mxu1 %vm592_vm0, %v531_v1 }
  0xb0   : > { %2013 = vmatmul.msk.f32.gmra.mxu2 %vm592_vm0, %v549_v2  ;;  %2031 = vmatmul.msk.f32.gmra.mxu3 %vm592_vm0, %v567_v3 }
  0xb7   : > { %1974 = vmatmul.msk.f32.gmra.mxu0 %vm592_vm0, %v510_v4  ;;  %1996 = vmatmul.msk.f32.gmra.mxu1 %vm592_vm0, %v532_v5 }
  0xb8   : > { %2014 = vmatmul.msk.f32.gmra.mxu2 %vm592_vm0, %v550_v6  ;;  %2032 = vmatmul.msk.f32.gmra.mxu3 %vm592_vm0, %v568_v7 }
  0xbf   : > { %1975 = vmatmul.msk.f32.gmra.mxu0 %vm592_vm0, %v511_v8  ;;  %1997 = vmatmul.msk.f32.gmra.mxu1 %vm592_vm0, %v533_v9  ;;  %v515_v8 = vld [vmem:[%s2323_s30 + $0x98] sm:$0xff] }
  0xc0   : > { %2015 = vmatmul.msk.f32.gmra.mxu2 %vm592_vm0, %v551_v10  ;;  %2033 = vmatmul.msk.f32.gmra.mxu3 %vm592_vm0, %v569_v11 }
  0xc4   : > { %v850_v13 = vpop.f32.mrf.mxu0  ;;  %v916_v14 = vpop.f32.mrf.mxu1 }
  0xc5   : > { %v851_v17 = vadd.f32 %v2486_v12, %v850_v13  ;;  %v917_v18 = vadd.f32 %v2486_v12, %v916_v14  ;;  %v573_v13 = vld [vmem:[%s2323_s30 + $0x268] sm:$0xff] }
  0xc7   : > { %1976 = vmatmul.msk.f32.gmra.mxu0 %vm592_vm0, %v512_v15  ;;  %1998 = vmatmul.msk.f32.gmra.mxu1 %vm592_vm0, %v534_v16  ;;  %v1112_v21 = vmax.f32 %v917_v18, 0.0  ;;  %v1090_v30 = vmax.f32 %v851_v17, 0.0  ;;  %v1626_v18 = vld [vmem:[%s2542_s19 + $0x18] sm:$0xff] }
  0xc8   : > { %2016 = vmatmul.msk.f32.gmra.mxu2 %vm592_vm0, %v552_v19  ;;  %2034 = vmatmul.msk.f32.gmra.mxu3 %vm592_vm0, %v570_v20 }
  0xc9   : > { %v1270_v35 = vsel %vm1170_vm1, %v1112_v21, -inf  ;;  %v1171_v38 = vsel %vm1170_vm1, %v1090_v30, -inf  ;;  %1705 = vmatpush.msrb.mxu2 %v1626_v18 }
  0xcb   : > { %v970_v22 = vpop.f32.mrf.mxu2  ;;  %v1024_v23 = vpop.f32.mrf.mxu3 }
  0xcc   : > { %v971_v24 = vadd.f32 %v2486_v12, %v970_v22  ;;  %v1025_v25 = vadd.f32 %v2486_v12, %v1024_v23  ;;  %v853_v26 = vpop.f32.mrf.mxu0  ;;  %v919_v27 = vpop.f32.mrf.mxu1 }
  0xcd   : > { %v854_v31 = vadd.f32 %v2486_v12, %v853_v26  ;;  %v920_v32 = vadd.f32 %v2486_v12, %v919_v27 }
  0xce   : > { %v1130_v41 = vmax.f32 %v971_v24, 0.0  ;;  %v1148_v42 = vmax.f32 %v1025_v25, 0.0 }
  0xcf   : > { %v1091_v36 = vmax.f32 %v854_v31, 0.0  ;;  %v1113_v37 = vmax.f32 %v920_v32, 0.0  ;;  %1977 = vmatmul.msk.f32.gmra.mxu0 %vm592_vm0, %v513_v28  ;;  %1999 = vmatmul.msk.f32.gmra.mxu1 %vm592_vm0, %v535_v29  ;;  %v1635_v28 = vld [vmem:[%s2551_s25 + $0x18] sm:$0xff] }
  0xd0   : > { %2017 = vmatmul.msk.f32.gmra.mxu2 %vm592_vm0, %v553_v33  ;;  %2035 = vmatmul.msk.f32.gmra.mxu3 %vm592_vm0, %v571_v34  ;;  %v1351_v55 = vsel %vm1170_vm1, %v1130_v41, -inf  ;;  %v1432_v56 = vsel %vm1170_vm1, %v1148_v42, -inf  ;;  %v516_v34 = vld [vmem:[%s2323_s30 + $0xa0] sm:$0xff] }
  0xd1   : > { %v1172_v39 = vsel %vm1170_vm1, %v1091_v36, -inf  ;;  %v1271_v40 = vsel %vm1170_vm1, %v1113_v37, -inf  ;;  %1663 = vmatpush.msrb.mxu1 %v1635_v28 }
  0xd2   : > { %v1173_v43 = vmax.f32 %v1171_v38, %v1172_v39  ;;  %v2514_v44 = vmax.f32 %v1270_v35, %v1271_v40  ;;  %v574_v39 = vld [vmem:[%s2323_s30 + $0x270] sm:$0xff] }
  0xd3   : > { %v973_v45 = vpop.f32.mrf.mxu2  ;;  %v1027_v46 = vpop.f32.mrf.mxu3 }
  0xd4   : > { %v974_v47 = vadd.f32 %v2486_v12, %v973_v45  ;;  %v1028_v48 = vadd.f32 %v2486_v12, %v1027_v46  ;;  %v856_v49 = vpop.f32.mrf.mxu0  ;;  %v922_v50 = vpop.f32.mrf.mxu1  ;;  %v1174_v59 = vrot.slane %v1173_v43, 4 }
  0xd5   : > { %v857_v52 = vadd.f32 %v2486_v12, %v856_v49  ;;  %v923_v53 = vadd.f32 %v2486_v12, %v922_v50 }
  0xd6   : > { %v1131_v57 = vmax.f32 %v974_v47, 0.0  ;;  %v1149_v58 = vmax.f32 %v1028_v48, 0.0  ;;  %v1175_v3 = vmax.f32 %v1173_v43, %v1174_v59 }
  0xd7   : > { %1978 = vmatmul.msk.f32.gmra.mxu0 %vm592_vm0, %v514_v51  ;;  %v1114_v0 = vmax.f32 %v923_v53, 0.0  ;;  %v1092_v9 = vmax.f32 %v857_v52, 0.0 }
  0xd8   : > { %v1352_v60 = vsel %vm1170_vm1, %v1131_v57, -inf  ;;  %v1433_v61 = vsel %vm1170_vm1, %v1149_v58, -inf  ;;  %2036 = vmatmul.msk.f32.gmra.mxu3 %vm592_vm0, %v572_v54  ;;  %v1176_v17 = vrot.slane %v1175_v3, 2 }
  0xd9   : > { %v2528_v62 = vmax.f32 %v1351_v55, %v1352_v60  ;;  %v2530_v63 = vmax.f32 %v1432_v56, %v1433_v61  ;;  %v1279_v14 = vsel %vm1170_vm1, %v1114_v0, -inf  ;;  %v1180_v19 = vsel %vm1170_vm1, %v1092_v9, -inf  ;;  %v517_v60 = vld [vmem:[%s2323_s30 + $0xa8] sm:$0xff] }
  0xda   : > { %v1177_v35 = vmax.f32 %v1175_v3, %v1176_v17 }
  0xdb   : > { %v976_v1 = vpop.f32.mrf.mxu2  ;;  %v1030_v2 = vpop.f32.mrf.mxu3 }
  0xdc   : > { %v977_v4 = vadd.f32 %v2486_v12, %v976_v1  ;;  %v1031_v5 = vadd.f32 %v2486_v12, %v1030_v2  ;;  %v859_v6 = vpop.f32.mrf.mxu0  ;;  %v925_v7 = vpop.f32.mrf.mxu1  ;;  %v1178_v50 = vrot.slane %v1177_v35, 1  ;;  %v575_v2 = vld [vmem:[%s2323_s30 + $0x278] sm:$0xff] }
  0xdd   : > { %v860_v10 = vadd.f32 %v2486_v12, %v859_v6  ;;  %v926_v11 = vadd.f32 %v2486_v12, %v925_v7 }
  0xde   : > { %v1132_v20 = vmax.f32 %v977_v4, 0.0  ;;  %v1150_v23 = vmax.f32 %v1031_v5, 0.0  ;;  %v1179_v3 = vmax.f32 %v1177_v35, %v1178_v50 }
  0xdf   : > { %v1093_v15 = vmax.f32 %v860_v10, 0.0  ;;  %v1115_v16 = vmax.f32 %v926_v11, 0.0  ;;  %1979 = vmatmul.msk.f32.gmra.mxu0 %vm592_vm0, %v515_v8 }
  0xe0   : > { %2037 = vmatmul.msk.f32.gmra.mxu3 %vm592_vm0, %v573_v13  ;;  %v1360_v36 = vsel %vm1170_vm1, %v1132_v20, -inf  ;;  %v1441_v40 = vsel %vm1170_vm1, %v1150_v23, -inf }
  0xe1   : > { %v1181_v21 = vsel %vm1170_vm1, %v1093_v15, -inf  ;;  %v1280_v22 = vsel %vm1170_vm1, %v1115_v16, -inf }
  0xe2   : > { %v1182_v24 = vmax.f32 %v1180_v19, %v1181_v21  ;;  %v2556_v25 = vmax.f32 %v1279_v14, %v1280_v22 }
  0xe3   : > { %v979_v26 = vpop.f32.mrf.mxu2  ;;  %v1033_v27 = vpop.f32.mrf.mxu3 }
  0xe4   : > { %v1183_v29 = vrot.slane %v1182_v24, 4  ;;  %v980_v30 = vadd.f32 %v2486_v12, %v979_v26  ;;  %v1034_v31 = vadd.f32 %v2486_v12, %v1033_v27  ;;  %v862_v32 = vpop.f32.mrf.mxu0  ;;  %v928_v33 = vpop.f32.mrf.mxu1 }
  0xe5   : > { %v863_v37 = vadd.f32 %v2486_v12, %v862_v32  ;;  %v929_v38 = vadd.f32 %v2486_v12, %v928_v33 }
  0xe6   : > { %v1184_v41 = vmax.f32 %v1182_v24, %v1183_v29  ;;  %v1133_v42 = vmax.f32 %v980_v30, 0.0  ;;  %v1151_v43 = vmax.f32 %v1034_v31, 0.0 }
  0xe7   : > { %1980 = vmatmul.msk.f32.gmra.mxu0 %vm592_vm0, %v516_v34  ;;  %v1116_v52 = vmax.f32 %v929_v38, 0.0  ;;  %v1094_v61 = vmax.f32 %v863_v37, 0.0 }
  0xe8   : > { %v1185_v45 = vrot.slane %v1184_v41, 2  ;;  %v1361_v46 = vsel %vm1170_vm1, %v1133_v42, -inf  ;;  %v1442_v47 = vsel %vm1170_vm1, %v1151_v43, -inf  ;;  %2038 = vmatmul.msk.f32.gmra.mxu3 %vm592_vm0, %v574_v39 }
  0xe9   : > { %v2571_v48 = vmax.f32 %v1360_v36, %v1361_v46  ;;  %v2573_v49 = vmax.f32 %v1441_v40, %v1442_v47  ;;  %v1288_v5 = vsel %vm1170_vm1, %v1116_v52, -inf  ;;  %v1189_v9 = vsel %vm1170_vm1, %v1094_v61, -inf }
  0xea   : > { %v1186_v51 = vmax.f32 %v1184_v41, %v1185_v45 }
  0xeb   : > { %v982_v53 = vpop.f32.mrf.mxu2  ;;  %v1036_v54 = vpop.f32.mrf.mxu3 }
  0xec   : > { %v1187_v55 = vrot.slane %v1186_v51, 1  ;;  %v983_v56 = vadd.f32 %v2486_v12, %v982_v53  ;;  %v1037_v57 = vadd.f32 %v2486_v12, %v1036_v54  ;;  %v865_v58 = vpop.f32.mrf.mxu0  ;;  %v931_v59 = vpop.f32.mrf.mxu1 }
  0xed   : > { %v866_v0 = vadd.f32 %v2486_v12, %v865_v58  ;;  %v932_v1 = vadd.f32 %v2486_v12, %v931_v59 }
  0xee   : > { %v1188_v4 = vmax.f32 %v1186_v51, %v1187_v55  ;;  %v1134_v10 = vmax.f32 %v983_v56, 0.0  ;;  %v1152_v14 = vmax.f32 %v1037_v57, 0.0 }
  0xef   : > { %v1095_v6 = vmax.f32 %v866_v0, 0.0  ;;  %v1117_v7 = vmax.f32 %v932_v1, 0.0  ;;  %1981 = vmatmul.msk.f32.gmra.mxu0 %vm592_vm0, %v517_v60 }
  0xf0   : > { %v1572_v8 = vsel %vm1571_vm2, %v1188_v4, %v1179_v3  ;;  %2039 = vmatmul.msk.f32.gmra.mxu3 %vm592_vm0, %v575_v2  ;;  %v1369_v24 = vsel %vm1170_vm1, %v1134_v10, -inf  ;;  %v1450_v28 = vsel %vm1170_vm1, %v1152_v14, -inf }
  0xf1   : > { %v1190_v11 = vsel %vm1170_vm1, %v1095_v6, -inf  ;;  %v1289_v13 = vsel %vm1170_vm1, %v1117_v7, -inf }
  0xf2   : > { %v1191_v15 = vmax.f32 %v1189_v9, %v1190_v11  ;;  %v2588_v16 = vmax.f32 %v1288_v5, %v1289_v13 }
  0xf3   : > { %v985_v17 = vpop.f32.mrf.mxu2  ;;  %v1039_v18 = vpop.f32.mrf.mxu3 }
  0xf4   : > { %v1192_v19 = vrot.slane %v1191_v15, 4  ;;  %v986_v20 = vadd.f32 %v2486_v12, %v985_v17  ;;  %v1040_v21 = vadd.f32 %v2486_v12, %v1039_v18  ;;  %v868_v22 = vpop.f32.mrf.mxu0  ;;  %v934_v23 = vpop.f32.mrf.mxu1  ;;  %v1625_v17 = vld [vmem:[%s2542_s19 + $0x10] sm:$0xff] }
  0xf5   : > { %v869_v26 = vadd.f32 %v2486_v12, %v868_v22  ;;  %v935_v27 = vadd.f32 %v2486_v12, %v934_v23  ;;  %v1634_v18 = vld [vmem:[%s2551_s25 + $0x10] sm:$0xff]  ;;  %1706 = vmatpush.msrb.mxu2 %v1625_v17 }
  0xf6   : > { %v1193_v29 = vmax.f32 %v1191_v15, %v1192_v19  ;;  %v1135_v30 = vmax.f32 %v986_v20, 0.0  ;;  %v1153_v31 = vmax.f32 %v1040_v21, 0.0  ;;  %1664 = vmatpush.msrb.mxu1 %v1634_v18 }
  0xf7   : > { %v1118_v38 = vmax.f32 %v935_v27, 0.0  ;;  %v1096_v47 = vmax.f32 %v869_v26, 0.0 }
  0xf8   : > { %v1194_v32 = vrot.slane %v1193_v29, 2  ;;  %v1370_v33 = vsel %vm1170_vm1, %v1135_v30, -inf  ;;  %v1451_v34 = vsel %vm1170_vm1, %v1153_v31, -inf }
  0xf9   : > { %v2598_v35 = vmax.f32 %v1369_v24, %v1370_v33  ;;  %v2600_v36 = vmax.f32 %v1450_v28, %v1451_v34  ;;  %v1297_v53 = vsel %vm1170_vm1, %v1118_v38, -inf  ;;  %v1198_v57 = vsel %vm1170_vm1, %v1096_v47, -inf }
  0xfa   : > { %v1195_v37 = vmax.f32 %v1193_v29, %v1194_v32 }
  0xfb   : > { %v988_v39 = vpop.f32.mrf.mxu2  ;;  %v1042_v40 = vpop.f32.mrf.mxu3 }
  0xfc   : > { %v1196_v41 = vrot.slane %v1195_v37, 1  ;;  %v989_v42 = vadd.f32 %v2486_v12, %v988_v39  ;;  %v1043_v43 = vadd.f32 %v2486_v12, %v1042_v40  ;;  %v871_v45 = vpop.f32.mrf.mxu0  ;;  %v937_v46 = vpop.f32.mrf.mxu1 }
  0xfd   : > { %v872_v50 = vadd.f32 %v2486_v12, %v871_v45  ;;  %v938_v51 = vadd.f32 %v2486_v12, %v937_v46 }
  0xfe   : > { %v1197_v52 = vmax.f32 %v1195_v37, %v1196_v41  ;;  %v1136_v58 = vmax.f32 %v989_v42, 0.0  ;;  %v1154_v61 = vmax.f32 %v1043_v43, 0.0 }
  0xff   : > { %v1097_v54 = vmax.f32 %v872_v50, 0.0  ;;  %v1119_v55 = vmax.f32 %v938_v51, 0.0 }
 0x100   : > { %v1574_v56 = vsel %vm1573_vm3, %v1197_v52, %v1572_v8  ;;  %v1378_v9 = vsel %vm1170_vm1, %v1136_v58, -inf  ;;  %v1459_v11 = vsel %vm1170_vm1, %v1154_v61, -inf }
 0x101   : > { %v1199_v59 = vsel %vm1170_vm1, %v1097_v54, -inf  ;;  %v1298_v60 = vsel %vm1170_vm1, %v1119_v55, -inf }
 0x102   : > { %v1200_v0 = vmax.f32 %v1198_v57, %v1199_v59  ;;  %v2611_v1 = vmax.f32 %v1297_v53, %v1298_v60 }
 0x103   : > { %v991_v2 = vpop.f32.mrf.mxu2  ;;  %v1045_v3 = vpop.f32.mrf.mxu3 }
 0x104   : > { %v1201_v4 = vrot.slane %v1200_v0, 4  ;;  %v992_v5 = vadd.f32 %v2486_v12, %v991_v2  ;;  %v1046_v6 = vadd.f32 %v2486_v12, %v1045_v3  ;;  %v874_v7 = vpop.f32.mrf.mxu0  ;;  %v940_v8 = vpop.f32.mrf.mxu1 }
 0x105   : > { %v941_v10 = vadd.f32 %v2486_v12, %v940_v8  ;;  %v875_v24 = vadd.f32 %v2486_v12, %v874_v7  ;;  %v1354_v8 = vrot.slane %v2528_v62, 4 }
 0x106   : > { %v1202_v13 = vmax.f32 %v1200_v0, %v1201_v4  ;;  %v1137_v14 = vmax.f32 %v992_v5, 0.0  ;;  %v1155_v15 = vmax.f32 %v1046_v6, 0.0 }
 0x107   : > { %v1120_v27 = vmax.f32 %v941_v10, 0.0  ;;  %v1098_v37 = vmax.f32 %v875_v24, 0.0 }
 0x108   : > { %v1203_v19 = vrot.slane %v1202_v13, 2  ;;  %v1379_v20 = vsel %vm1170_vm1, %v1137_v14, -inf  ;;  %v1460_v21 = vsel %vm1170_vm1, %v1155_v15, -inf }
 0x109   : > { %v2622_v22 = vmax.f32 %v1378_v9, %v1379_v20  ;;  %v1461_v23 = vmax.f32 %v1459_v11, %v1460_v21  ;;  %v1306_v42 = vsel %vm1170_vm1, %v1120_v27, -inf  ;;  %v1207_v47 = vsel %vm1170_vm1, %v1098_v37, -inf }
 0x10a   : > { %v1204_v26 = vmax.f32 %v1202_v13, %v1203_v19  ;;  %v1435_v9 = vrot.slane %v2530_v63, 4  ;;  %v1355_v20 = vmax.f32 %v2528_v62, %v1354_v8 }
 0x10b   : > { %v994_v28 = vpop.f32.mrf.mxu2  ;;  %v1048_v29 = vpop.f32.mrf.mxu3  ;;  %v1462_v41 = vrot.slane %v1461_v23, 4 }
 0x10c   : > { %v1205_v30 = vrot.slane %v1204_v26, 1  ;;  %v995_v31 = vadd.f32 %v2486_v12, %v994_v28  ;;  %v1049_v32 = vadd.f32 %v2486_v12, %v1048_v29  ;;  %v877_v33 = vpop.f32.mrf.mxu0  ;;  %v943_v34 = vpop.f32.mrf.mxu1  ;;  %v1436_v21 = vmax.f32 %v2530_v63, %v1435_v9  ;;  %v1624_v9 = vld [vmem:[%s2542_s19 + $0x8] sm:$0xff] }
 0x10d   : > { %v878_v38 = vadd.f32 %v2486_v12, %v877_v33  ;;  %v944_v39 = vadd.f32 %v2486_v12, %v943_v34  ;;  %v1463_v57 = vmax.f32 %v1461_v23, %v1462_v41  ;;  %v1356_v63 = vrot.slane %v1355_v20, 2  ;;  %1707 = vmatpush.msrb.mxu2 %v1624_v9 }
 0x10e   : > { %v1206_v40 = vmax.f32 %v1204_v26, %v1205_v30  ;;  %v1138_v50 = vmax.f32 %v995_v31, 0.0  ;;  %v1156_v53 = vmax.f32 %v1049_v32, 0.0  ;;  %v1437_v41 = vrot.slane %v1436_v21, 2 }
 0x10f   : > { %v1099_v43 = vmax.f32 %v878_v38, 0.0  ;;  %v1121_v45 = vmax.f32 %v944_v39, 0.0  ;;  %v1464_v10 = vrot.slane %v1463_v57, 2 }
 0x110   : > { %v1576_v46 = vsel %vm1575_vm4, %v1206_v40, %v1574_v56  ;;  %v1387_v3 = vsel %vm1170_vm1, %v1138_v50, -inf  ;;  %v1468_v4 = vsel %vm1170_vm1, %v1156_v53, -inf }
 0x111   : > { %v1208_v51 = vsel %vm1170_vm1, %v1099_v43, -inf  ;;  %v1307_v52 = vsel %vm1170_vm1, %v1121_v45, -inf  ;;  %v1465_v27 = vmax.f32 %v1463_v57, %v1464_v10  ;;  %v1357_v57 = vmax.f32 %v1355_v20, %v1356_v63 }
 0x112   : > { %v1209_v54 = vmax.f32 %v1207_v47, %v1208_v51  ;;  %v2634_v55 = vmax.f32 %v1306_v42, %v1307_v52 }
 0x113   : > { %v997_v58 = vpop.f32.mrf.mxu2  ;;  %v1051_v59 = vpop.f32.mrf.mxu3  ;;  %v1466_v42 = vrot.slane %v1465_v27, 1 }
 0x114   : > { %v1210_v60 = vrot.slane %v1209_v54, 4  ;;  %v998_v61 = vadd.f32 %v2486_v12, %v997_v58  ;;  %v1052_v0 = vadd.f32 %v2486_v12, %v1051_v59  ;;  %v880_v56 = vpop.f32.mrf.mxu0  ;;  %v2638_v2 = vpop.f32.mrf.mxu1 }
 0x115   : > { %v881_v15 = vadd.f32 %v2486_v12, %v880_v56 }
 0x116   : > { %v1211_v5 = vmax.f32 %v1209_v54, %v1210_v60  ;;  %v1139_v6 = vmax.f32 %v998_v61, 0.0  ;;  %v1157_v7 = vmax.f32 %v1052_v0, 0.0  ;;  %v2659_v61 = vmax.f32 %v1436_v21, %v1437_v41 }
 0x117   : > { %v1100_v29 = vmax.f32 %v881_v15, 0.0  ;;  %v1358_v15 = vrot.slane %v1357_v57, 1 }
 0x118   : > { %v1212_v11 = vrot.slane %v1211_v5, 2  ;;  %v1388_v13 = vsel %vm1170_vm1, %v1139_v6, -inf  ;;  %v1469_v14 = vsel %vm1170_vm1, %v1157_v7, -inf }
 0x119   : > { %v1389_v17 = vmax.f32 %v1387_v3, %v1388_v13  ;;  %v1470_v18 = vmax.f32 %v1468_v4, %v1469_v14  ;;  %v1216_v43 = vsel %vm1170_vm1, %v1100_v29, -inf }
 0x11a   : > { %v1213_v19 = vmax.f32 %v1211_v5, %v1212_v11  ;;  %v1467_v5 = vmax.f32 %v1465_v27, %v1466_v42  ;;  %v1363_v27 = vrot.slane %v2571_v48, 4 }
 0x11b   : > { %v1471_v23 = vrot.slane %v1470_v18, 4  ;;  %v1000_v24 = vpop.f32.mrf.mxu2  ;;  %v1054_v26 = vpop.f32.mrf.mxu3  ;;  %v1390_v33 = vrot.slane %v1389_v17, 4 }
 0x11c   : > { %v1214_v28 = vrot.slane %v1213_v19, 1  ;;  %v1055_v30 = vadd.f32 %v2486_v12, %v1054_v26  ;;  %v883_v31 = vpop.f32.mrf.mxu0  ;;  %v2650_v32 = vpop.f32.mrf.mxu1  ;;  %v1001_v37 = vadd.f32 %v2486_v12, %v1000_v24  ;;  %v1439_v26 = vrot.slane %v2659_v61, 1 }
 0x11d   : > { %v1472_v34 = vmax.f32 %v1470_v18, %v1471_v23  ;;  %v884_v62 = vadd.f32 %v2486_v12, %v883_v31  ;;  %v1391_v47 = vmax.f32 %v1389_v17, %v1390_v33  ;;  %v1444_v31 = vrot.slane %v2573_v49, 4 }
 0x11e   : > { %v1215_v38 = vmax.f32 %v1213_v19, %v1214_v28  ;;  %v1140_v51 = vmax.f32 %v1001_v37, 0.0  ;;  %v1158_v53 = vmax.f32 %v1055_v30, 0.0  ;;  %v2677_v30 = vmax.f32 %v1357_v57, %v1358_v15  ;;  %v1633_v57 = vld [vmem:[%s2551_s25 + $0x8] sm:$0xff] }
 0x11f   : > { %v1473_v39 = vrot.slane %v1472_v34, 2  ;;  %v1101_v40 = vmax.f32 %v884_v62, 0.0  ;;  %v1392_v6 = vrot.slane %v1391_v47, 2  ;;  %1665 = vmatpush.msrb.mxu1 %v1633_v57 }
 0x120   : > { %v2656_v45 = vsel %vm1577_vm5, %v1215_v38, %v1576_v46  ;;  %v1396_v8 = vsel %vm1170_vm1, %v1140_v51, -inf  ;;  %v1477_v10 = vsel %vm1170_vm1, %v1158_v53, -inf  ;;  %v2690_v51 = vmax.f32 %v2571_v48, %v1363_v27 }
 0x121   : > { %v1474_v50 = vmax.f32 %v1472_v34, %v1473_v39  ;;  %v1217_v52 = vsel %vm1170_vm1, %v1101_v40, -inf  ;;  %v1393_v28 = vmax.f32 %v1391_v47, %v1392_v6  ;;  %v947_v53 = vadd.f32 %v2486_v12, %v2638_v2 }
 0x122   : > { %v1218_v54 = vmax.f32 %v1216_v43, %v1217_v52  ;;  %v950_v48 = vadd.f32 %v2486_v12, %v2650_v32 }
 0x123   : > { %v1475_v58 = vrot.slane %v1474_v50, 1  ;;  %v1003_v59 = vpop.f32.mrf.mxu2  ;;  %v1057_v60 = vpop.f32.mrf.mxu3  ;;  %v1394_v52 = vrot.slane %v1393_v28, 1 }
 0x124   : > { %v1219_v0 = vrot.slane %v1218_v54, 4  ;;  %v1004_v56 = vadd.f32 %v2486_v12, %v1003_v59  ;;  %v1058_v46 = vadd.f32 %v2486_v12, %v1057_v60  ;;  %v886_v3 = vpop.f32.mrf.mxu0  ;;  %v2663_v4 = vpop.f32.mrf.mxu1 }
 0x125   : > { %v1476_v7 = vmax.f32 %v1474_v50, %v1475_v58  ;;  %v887_v21 = vadd.f32 %v2486_v12, %v886_v3  ;;  %v2696_v58 = vmax.f32 %v2573_v49, %v1444_v31  ;;  %v1623_v3 = vld [vmem:[%s2542_s19] sm:$0xff]  ;;  %v1395_v9 = vmax.f32 %v1393_v28, %v1394_v52 }
 0x126   : > { %v1220_v11 = vmax.f32 %v1218_v54, %v1219_v0  ;;  %v1141_v13 = vmax.f32 %v1004_v56, 0.0  ;;  %v1159_v14 = vmax.f32 %v1058_v46, 0.0  ;;  %1708 = vmatpush.msrb.mxu2 %v1623_v3 }
 0x127   : > { %v2669_v17 = vsel %vm1571_vm2, %v1476_v7, %v1467_v5  ;;  %v1102_v63 = vmax.f32 %v887_v21, 0.0 }
 0x128   : > { %v1221_v18 = vrot.slane %v1220_v11, 2  ;;  %v1397_v19 = vsel %vm1170_vm1, %v1141_v13, -inf  ;;  %v1478_v20 = vsel %vm1170_vm1, %v1159_v14, -inf  ;;  %v953_v14 = vadd.f32 %v2486_v12, %v2663_v4 }
 0x129   : > { %v1398_v23 = vmax.f32 %v1396_v8, %v1397_v19  ;;  %v1479_v24 = vmax.f32 %v1477_v10, %v1478_v20  ;;  %v1225_v56 = vsel %vm1170_vm1, %v1102_v63, -inf  ;;  %v1365_v8 = vrot.slane %v2690_v51, 2 }
 0x12a   : > { %v1222_v29 = vmax.f32 %v1220_v11, %v1221_v18  ;;  %v1122_v10 = vmax.f32 %v947_v53, 0.0  ;;  %v1123_v19 = vmax.f32 %v950_v48, 0.0  ;;  %v1446_v53 = vrot.slane %v2696_v58, 2 }
 0x12b   : > { %v1399_v33 = vrot.slane %v1398_v23, 4  ;;  %v1480_v34 = vrot.slane %v1479_v24, 4  ;;  %v1006_v37 = vpop.f32.mrf.mxu2  ;;  %v1060_v62 = vpop.f32.mrf.mxu3 }
 0x12c   : > { %v1223_v38 = vrot.slane %v1222_v29, 1  ;;  %v1007_v39 = vadd.f32 %v2486_v12, %v1006_v37  ;;  %v1061_v40 = vadd.f32 %v2486_v12, %v1060_v62  ;;  %v889_v41 = vpop.f32.mrf.mxu0  ;;  %v955_v42 = vpop.f32.mrf.mxu1 }
 0x12d   : > { %v1400_v43 = vmax.f32 %v1398_v23, %v1399_v33  ;;  %v1481_v47 = vmax.f32 %v1479_v24, %v1480_v34  ;;  %v890_v50 = vadd.f32 %v2486_v12, %v889_v41  ;;  %v1627_v41 = vld [vmem:[%s2723_s28] sm:$0xff] }
 0x12e   : > { %v1224_v54 = vmax.f32 %v1222_v29, %v1223_v38  ;;  %v1142_v46 = vmax.f32 %v1007_v39, 0.0  ;;  %v1160_v6 = vmax.f32 %v1061_v40, 0.0  ;;  %v1632_v38 = vld [vmem:[%s2551_s25] sm:$0xff]  ;;  %v1124_v39 = vmax.f32 %v953_v14, 0.0 }
 0x12f   : > { %v1401_v59 = vrot.slane %v1400_v43, 2  ;;  %v1482_v60 = vrot.slane %v1481_v47, 2  ;;  %v1103_v0 = vmax.f32 %v890_v50, 0.0  ;;  %1666 = vmatpush.msrb.mxu1 %v1632_v38 }
 0x130   : > { %v2708_v2 = vsel %vm1579_vm6, %v1224_v54, %v2656_v45  ;;  %v956_v45 = vadd.f32 %v2486_v12, %v955_v42  ;;  %v1405_v29 = vsel %vm1170_vm1, %v1142_v46, -inf  ;;  %v1486_v31 = vsel %vm1170_vm1, %v1160_v6, -inf  ;;  %2040 = vmatmul.msk.f32.vlgmr.msrb.gmra.mxu1 %vm1170_vm1, %v1627_v41 }
 0x131   : > { %v1402_v49 = vmax.f32 %v1400_v43, %v1401_v59  ;;  %v1483_v5 = vmax.f32 %v1481_v47, %v1482_v60  ;;  %v1226_v7 = vsel %vm1170_vm1, %v1103_v0, -inf  ;;  %v1315_v54 = vsel %vm1170_vm1, %v1122_v10, -inf }
 0x132   : > { %v1227_v11 = vmax.f32 %v1225_v56, %v1226_v7  ;;  %v1125_v40 = vmax.f32 %v956_v45, 0.0  ;;  %v1316_v60 = vsel %vm1170_vm1, %v1123_v19, -inf  ;;  %v1324_v48 = vsel %vm1170_vm1, %v1124_v39, -inf }
 0x133   : > { %v1403_v32 = vrot.slane %v1402_v49, 1  ;;  %v1484_v13 = vrot.slane %v1483_v5, 1  ;;  %v1009_v15 = vpop.f32.mrf.mxu2  ;;  %v1063_v18 = vpop.f32.mrf.mxu3  ;;  %v2765_v39 = vmax.f32 %v2690_v51, %v1365_v8 }
 0x134   : > { %v1228_v20 = vrot.slane %v1227_v11, 4  ;;  %v1010_v21 = vadd.f32 %v2486_v12, %v1009_v15  ;;  %v1064_v23 = vadd.f32 %v2486_v12, %v1063_v18  ;;  %v892_v24 = vpop.f32.mrf.mxu0  ;;  %v958_v27 = vpop.f32.mrf.mxu1  ;;  %v1325_v56 = vsel %vm1170_vm1, %v1125_v40, -inf }
 0x135   : > { %v1404_v4 = vmax.f32 %v1402_v49, %v1403_v32  ;;  %v1485_v28 = vmax.f32 %v1483_v5, %v1484_v13  ;;  %v959_v62 = vadd.f32 %v2486_v12, %v958_v27  ;;  %v893_v52 = vadd.f32 %v2486_v12, %v892_v24 }
 0x136   : > { %v1229_v33 = vmax.f32 %v1227_v11, %v1228_v20  ;;  %v1143_v34 = vmax.f32 %v1010_v21, 0.0  ;;  %v1161_v37 = vmax.f32 %v1064_v23, 0.0  ;;  %v1317_v18 = vmax.f32 %v1315_v54, %v1316_v60 }
 0x137   : > { %v2734_v63 = vsel %vm1571_vm2, %v1404_v4, %v1395_v9  ;;  %v2739_v42 = vsel %vm1573_vm3, %v1485_v28, %v2669_v17  ;;  %v1126_v17 = vmax.f32 %v959_v62, 0.0  ;;  %v1104_v7 = vmax.f32 %v893_v52, 0.0 }
 0x138   : > { %v1230_v43 = vrot.slane %v1229_v33, 2  ;;  %v1406_v47 = vsel %vm1170_vm1, %v1143_v34, -inf  ;;  %v1487_v50 = vsel %vm1170_vm1, %v1161_v37, -inf  ;;  %v1326_v20 = vmax.f32 %v1324_v48, %v1325_v56 }
 0x139   : > { %v1407_v57 = vmax.f32 %v1405_v29, %v1406_v47  ;;  %v1488_v59 = vmax.f32 %v1486_v31, %v1487_v50  ;;  %v1333_v21 = vsel %vm1170_vm1, %v1126_v17, -inf  ;;  %v1234_v28 = vsel %vm1170_vm1, %v1104_v7, -inf }
 0x13a   : > { %v1231_v0 = vmax.f32 %v1229_v33, %v1230_v43  ;;  %v1372_v40 = vrot.slane %v2598_v35, 4  ;;  %v1453_v47 = vrot.slane %v2600_v36, 4  ;;  %v1318_v50 = vrot.slane %v1317_v18, 4 }
 0x13b   : > { %v1408_v46 = vrot.slane %v1407_v57, 4  ;;  %v1489_v3 = vrot.slane %v1488_v59, 4  ;;  %v1012_v49 = vpop.f32.mrf.mxu2  ;;  %v1066_v5 = vpop.f32.mrf.mxu3 }
 0x13c   : > { %v1232_v6 = vrot.slane %v1231_v0, 1  ;;  %v1013_v9 = vadd.f32 %v2486_v12, %v1012_v49  ;;  %v1067_v10 = vadd.f32 %v2486_v12, %v1066_v5  ;;  %v895_v11 = vpop.f32.mrf.mxu0  ;;  %v961_v32 = vpop.f32.mrf.mxu1 }
 0x13d   : > { %v1409_v13 = vmax.f32 %v1407_v57, %v1408_v46  ;;  %v1490_v14 = vmax.f32 %v1488_v59, %v1489_v3  ;;  %v896_v45 = vadd.f32 %v2486_v12, %v895_v11  ;;  %v962_v15 = vadd.f32 %v2486_v12, %v961_v32 }
 0x13e   : > { %v1233_v19 = vmax.f32 %v1231_v0, %v1232_v6  ;;  %v1144_v29 = vmax.f32 %v1013_v9, 0.0  ;;  %v1162_v31 = vmax.f32 %v1067_v10, 0.0  ;;  %v1327_v59 = vrot.slane %v1326_v20, 4 }
 0x13f   : > { %v1410_v23 = vrot.slane %v1409_v13, 2  ;;  %v1491_v24 = vrot.slane %v1490_v14, 2  ;;  %v1105_v27 = vmax.f32 %v896_v45, 0.0  ;;  %v1127_v4 = vmax.f32 %v962_v15, 0.0 }
 0x140   : > { %v2758_v33 = vsel %vm1581_vm7, %v1233_v19, %v2708_v2  ;;  %v1414_v46 = vsel %vm1170_vm1, %v1144_v29, -inf  ;;  %v1495_v3 = vsel %vm1170_vm1, %v1162_v31, -inf  ;;  %v1319_v9 = vmax.f32 %v1317_v18, %v1318_v50 }
 0x141   : > { %v1411_v34 = vmax.f32 %v1409_v13, %v1410_v23  ;;  %v1492_v37 = vmax.f32 %v1490_v14, %v1491_v24  ;;  %v1235_v62 = vsel %vm1170_vm1, %v1105_v27, -inf  ;;  %v1334_v38 = vsel %vm1170_vm1, %v1127_v4, -inf }
 0x142   : > { %v1236_v41 = vmax.f32 %v1234_v28, %v1235_v62  ;;  %v1335_v43 = vmax.f32 %v1333_v21, %v1334_v38  ;;  %v1328_v13 = vmax.f32 %v1326_v20, %v1327_v59  ;;  %v1367_v19 = vrot.slane %v2765_v39, 1 }
 0x143   : > { %v1412_v2 = vrot.slane %v1411_v34, 1  ;;  %v1493_v52 = vrot.slane %v1492_v37, 1  ;;  %v1015_v54 = vpop.f32.mrf.mxu2  ;;  %v1069_v57 = vpop.f32.mrf.mxu3  ;;  %v2790_v18 = vmax.f32 %v2696_v58, %v1446_v53  ;;  %v2793_v23 = vmax.f32 %v2598_v35, %v1372_v40 }
 0x144   : > { %v1237_v60 = vrot.slane %v1236_v41, 4  ;;  %v1016_v0 = vadd.f32 %v2486_v12, %v1015_v54  ;;  %v1070_v17 = vadd.f32 %v2486_v12, %v1069_v57  ;;  %v2771_v48 = vpop.f32.mrf.mxu0  ;;  %v964_v51 = vpop.f32.mrf.mxu1  ;;  %v1336_v5 = vrot.slane %v1335_v43, 4 }
 0x145   : > { %v1413_v8 = vmax.f32 %v1411_v34, %v1412_v2  ;;  %v1494_v56 = vmax.f32 %v1492_v37, %v1493_v52  ;;  %v965_v10 = vadd.f32 %v2486_v12, %v964_v51  ;;  %v2797_v27 = vmax.f32 %v2600_v36, %v1453_v47 }
 0x146   : > { %v1238_v49 = vmax.f32 %v1236_v41, %v1237_v60  ;;  %v1145_v6 = vmax.f32 %v1016_v0, 0.0  ;;  %v1163_v7 = vmax.f32 %v1070_v17, 0.0  ;;  %v1337_v24 = vmax.f32 %v1335_v43, %v1336_v5 }
 0x147   : > { %v2778_v11 = vsel %vm1573_vm3, %v1413_v8, %v2734_v63  ;;  %v2782_v32 = vsel %vm1575_vm4, %v1494_v56, %v2739_v42  ;;  %v1381_v42 = vrot.slane %v2622_v22, 4  ;;  %v1128_v29 = vmax.f32 %v965_v10, 0.0 }
 0x148   : > { %v1239_v14 = vrot.slane %v1238_v49, 2  ;;  %v1415_v45 = vsel %vm1170_vm1, %v1145_v6, -inf  ;;  %v1496_v15 = vsel %vm1170_vm1, %v1163_v7, -inf  ;;  %v1320_v58 = vrot.slane %v1319_v9, 2 }
 0x149   : > { %v1416_v21 = vmax.f32 %v1414_v46, %v1415_v45  ;;  %v1497_v63 = vmax.f32 %v1495_v3, %v1496_v15  ;;  %v1329_v53 = vrot.slane %v1328_v13, 2  ;;  %v1382_v43 = vmax.f32 %v2622_v22, %v1381_v42  ;;  %v2822_v15 = vld [vmem:[%s2343_s18] ss:$0 sm:$0xff] }
 0x14a   : > { %v1240_v20 = vmax.f32 %v1238_v49, %v1239_v14  ;;  %v1338_v47 = vrot.slane %v1337_v24, 2  ;;  %v1342_v57 = vsel %vm1170_vm1, %v1128_v29, -inf  ;;  %v1448_v60 = vrot.slane %v2790_v18, 1 }
 0x14b   : > { %v1417_v4 = vrot.slane %v1416_v21, 4  ;;  %v1498_v28 = vrot.slane %v1497_v63, 4  ;;  %v1018_v31 = vpop.f32.mrf.mxu2  ;;  %v1072_v34 = vpop.f32.mrf.mxu3  ;;  %v1321_v0 = vmax.f32 %v1319_v9, %v1320_v58  ;;  %v1330_v17 = vmax.f32 %v1328_v13, %v1329_v53 }
 0x14c   : > { %v2799_v37 = vpop.f32.mrf.mxu0  ;;  %v967_v62 = vpop.f32.mrf.mxu1  ;;  %v1241_v35 = vrot.slane %v1240_v20, 1  ;;  %v1019_v41 = vadd.f32 %v2486_v12, %v1018_v31  ;;  %v1073_v50 = vadd.f32 %v2486_v12, %v1072_v34  ;;  %v1374_v46 = vrot.slane %v2793_v23, 2 }
 0x14d   : > { %v1418_v38 = vmax.f32 %v1416_v21, %v1417_v4  ;;  %v1499_v40 = vmax.f32 %v1497_v63, %v1498_v28  ;;  %v968_v36 = vadd.f32 %v2486_v12, %v967_v62  ;;  %v1455_v3 = vrot.slane %v2797_v27, 2 }
 0x14e   : > { %v1242_v2 = vmax.f32 %v1240_v20, %v1241_v35  ;;  %v1146_v8 = vmax.f32 %v1019_v41, 0.0  ;;  %v1164_v49 = vmax.f32 %v1073_v50, 0.0  ;;  %v1383_v6 = vrot.slane %v1382_v43, 2 }
 0x14f   : > { %v1419_v52 = vrot.slane %v1418_v38, 2  ;;  %v1500_v54 = vrot.slane %v1499_v40, 2  ;;  %v1129_v59 = vmax.f32 %v968_v36, 0.0  ;;  %v1339_v7 = vmax.f32 %v1337_v24, %v1338_v47 }
 0x150   : > { %v1584_v22 = vsel %vm1583_vm8, %v1242_v2, %v2758_v33  ;;  %v1322_v14 = vrot.slane %v1321_v0, 1  ;;  %v1331_v20 = vrot.slane %v1330_v17, 1  ;;  %v1423_v29 = vsel %vm1170_vm1, %v1146_v8, -inf }
 0x151   : > { %v1420_v12 = vmax.f32 %v1418_v38, %v1419_v52  ;;  %v1501_v51 = vmax.f32 %v1499_v40, %v1500_v54  ;;  %v1343_v56 = vsel %vm1170_vm1, %v1129_v59, -inf  ;;  %1618 = vst.msk [vmem:[%s2809_s20] sm:$0xff] %vm1170_vm1, %v1584_v22  ;;  %2045 = vmatmul.msk.f32.vlgmr.msrb.gmra.mxu2 %vm1170_vm1, %v1584_v22  ;;  %v1504_v24 = vsel %vm1170_vm1, %v1164_v49, -inf }
 0x152   : > { %v1344_v5 = vmax.f32 %v1342_v57, %v1343_v56  ;;  %v1375_v53 = vmax.f32 %v2793_v23, %v1374_v46  ;;  %v1340_v62 = vrot.slane %v1339_v7, 1  ;;  %v1384_v40 = vmax.f32 %v1382_v43, %v1383_v6 }
 0x153   : > { %v1421_v9 = vrot.slane %v1420_v12, 1  ;;  %v1502_v33 = vrot.slane %v1501_v51, 1  ;;  %v1021_v10 = vpop.f32.mrf.mxu2  ;;  %v1075_v13 = vpop.f32.mrf.mxu3  ;;  %v1323_v50 = vmax.f32 %v1321_v0, %v1322_v14  ;;  %v1332_v2 = vmax.f32 %v1330_v17, %v1331_v20 }
 0x154   : > { %v1345_v45 = vrot.slane %v1344_v5, 4  ;;  %v1022_v21 = vadd.f32 %v2822_v15, %v1021_v10  ;;  %v1076_v63 = vadd.f32 %v2822_v15, %v1075_v13  ;;  %v904_v42 = vpop.f32.mrf.mxu0  ;;  %v1456_v57 = vmax.f32 %v2797_v27, %v1455_v3 }
 0x155   : > { %v1422_v4 = vmax.f32 %v1420_v12, %v1421_v9  ;;  %v1503_v28 = vmax.f32 %v1501_v51, %v1502_v33  ;;  %v905_v43 = vadd.f32 %v2822_v15, %v904_v42  ;;  %v1341_v59 = vmax.f32 %v1339_v7, %v1340_v62 }
 0x156   : > { %v1346_v31 = vmax.f32 %v1344_v5, %v1345_v45  ;;  %v1147_v34 = vmax.f32 %v1022_v21, 0.0  ;;  %v1165_v58 = vmax.f32 %v1076_v63, 0.0  ;;  %v1376_v12 = vrot.slane %v1375_v53, 1 }
 0x157   : > { %v2831_v35 = vsel %vm1575_vm4, %v1422_v4, %v2778_v11  ;;  %v2835_v38 = vsel %vm1577_vm5, %v1503_v28, %v2782_v32  ;;  %v1368_v11 = vmax.f32 %v2765_v39, %v1367_v19  ;;  %v902_v32 = vadd.f32 %v2822_v15, %v2799_v37 }
 0x158   : > { %v1347_v41 = vrot.slane %v1346_v31, 2  ;;  %v1424_v36 = vsel %vm1170_vm1, %v1147_v34, -inf  ;;  %v1505_v47 = vsel %vm1170_vm1, %v1165_v58, -inf  ;;  %v899_v51 = vadd.f32 %v2822_v15, %v2771_v48 }
 0x159   : > { %v1425_v52 = vmax.f32 %v1423_v29, %v1424_v36  ;;  %v1506_v54 = vmax.f32 %v1504_v24, %v1505_v47  ;;  %v1385_v46 = vrot.slane %v1384_v40, 1  ;;  %v1592_v39 = vsel %vm1571_vm2, %v1332_v2, %v1323_v50 }
 0x15a   : > { %v1348_v23 = vmax.f32 %v1346_v31, %v1347_v41  ;;  %v1107_v5 = vmax.f32 %v902_v32, 0.0  ;;  %v1108_v27 = vmax.f32 %v905_v43, 0.0  ;;  %v1593_v10 = vsel %vm1573_vm3, %v1341_v59, %v1592_v39 }
 0x15b   : > { %v1426_v0 = vrot.slane %v1425_v52, 4  ;;  %v1507_v17 = vrot.slane %v1506_v54, 4  ;;  %v1078_v22 = vpop.f32.mrf.mxu3  ;;  %v1106_v48 = vmax.f32 %v899_v51, 0.0  ;;  %v1377_v13 = vmax.f32 %v1375_v53, %v1376_v12 }
 0x15c   : > { %v1349_v8 = vrot.slane %v1348_v23, 1  ;;  %v907_v56 = vpop.f32.mrf.mxu0  ;;  %v1079_v3 = vadd.f32 %v2822_v15, %v1078_v22  ;;  %v1386_v14 = vmax.f32 %v1384_v40, %v1385_v46  ;;  %v1244_v4 = vsel %vm1170_vm1, %v1107_v5, -inf }
 0x15d   : > { %v1427_v19 = vmax.f32 %v1425_v52, %v1426_v0  ;;  %v1508_v37 = vmax.f32 %v1506_v54, %v1507_v17  ;;  %v908_v49 = vadd.f32 %v2822_v15, %v907_v56  ;;  %v1252_v28 = vsel %vm1170_vm1, %v1108_v27, -inf }
 0x15e   : > { %v1350_v6 = vmax.f32 %v1348_v23, %v1349_v8  ;;  %v1166_v29 = vmax.f32 %v1079_v3, 0.0  ;;  %v1243_v40 = vsel %vm1170_vm1, %v1106_v48, -inf  ;;  %v1457_v47 = vrot.slane %v1456_v57, 1  ;;  %v1628_v23 = vld [vmem:[%s2723_s28 + $0x8] sm:$0xff] }
 0x15f   : > { %v1428_v7 = vrot.slane %v1427_v19, 2  ;;  %v1509_v9 = vrot.slane %v1508_v37, 2  ;;  %v1109_v33 = vmax.f32 %v908_v49, 0.0  ;;  %v1245_v50 = vmax.f32 %v1243_v40, %v1244_v4  ;;  %2041 = vmatmul.msk.f32.gmra.mxu1 %vm1170_vm1, %v1628_v23 }
 0x160   : > { %v1594_v45 = vsel %vm1575_vm4, %v1350_v6, %v1593_v10  ;;  %v1440_v54 = vmax.f32 %v2659_v61, %v1439_v26  ;;  %v1449_v59 = vmax.f32 %v2790_v18, %v1448_v60  ;;  %v1458_v26 = vmax.f32 %v1456_v57, %v1457_v47 }
 0x161   : > { %v1429_v21 = vmax.f32 %v1427_v19, %v1428_v7  ;;  %v1510_v63 = vmax.f32 %v1508_v37, %v1509_v9  ;;  %v1253_v42 = vsel %vm1170_vm1, %v1109_v33, -inf  ;;  %v1595_v20 = vsel %vm1577_vm5, %v2677_v30, %v1594_v45  ;;  %v1629_v9 = vld [vmem:[%s2723_s28 + $0x10] sm:$0xff] }
 0x162   : > { %v1596_v24 = vsel %vm1579_vm6, %v1368_v11, %v1595_v20  ;;  %v1254_v58 = vmax.f32 %v1252_v28, %v1253_v42  ;;  %v1513_v11 = vsel %vm1170_vm1, %v1166_v29, -inf  ;;  %v1246_v12 = vrot.slane %v1245_v50, 4 }
 0x163   : > { %v1430_v31 = vrot.slane %v1429_v21, 1  ;;  %v1511_v34 = vrot.slane %v1510_v63, 1  ;;  %v1081_v53 = vpop.f32.mrf.mxu3  ;;  %v1597_v62 = vsel %vm1581_vm7, %v1377_v13, %v1596_v24  ;;  %v1273_v46 = vrot.slane %v2514_v44, 4 }
 0x164   : > { %v1082_v41 = vadd.f32 %v2822_v15, %v1081_v53  ;;  %v910_v30 = vpop.f32.mrf.mxu0  ;;  %v2867_v36 = vsel %vm1583_vm8, %v1386_v14, %v1597_v62  ;;  %v1255_v43 = vrot.slane %v1254_v58, 4  ;;  %v1282_v57 = vrot.slane %v2556_v25, 4 }
 0x165   : > { %v1431_v2 = vmax.f32 %v1429_v21, %v1430_v31  ;;  %v1512_v52 = vmax.f32 %v1510_v63, %v1511_v34  ;;  %1620 = vst.msk [vmem:[%s2809_s20 + $0x10] sm:$0xff] %vm1170_vm1, %v2867_v36  ;;  %v911_v8 = vadd.f32 %v2822_v15, %v910_v30  ;;  %v1291_v39 = vrot.slane %v2588_v16, 4 }
 0x166   : > { %v1167_v32 = vmax.f32 %v1082_v41, 0.0  ;;  %v1256_v60 = vmax.f32 %v1254_v58, %v1255_v43  ;;  %v1247_v37 = vmax.f32 %v1245_v50, %v1246_v12  ;;  %v1274_v27 = vmax.f32 %v2514_v44, %v1273_v46 }
 0x167   : > { %v1602_v0 = vsel %vm1577_vm5, %v1431_v2, %v2831_v35  ;;  %v1610_v17 = vsel %vm1579_vm6, %v1512_v52, %v2835_v38  ;;  %v1110_v5 = vmax.f32 %v911_v8, 0.0  ;;  %v1300_v3 = vrot.slane %v2611_v1, 4  ;;  %2042 = vmatmul.msk.f32.gmra.mxu1 %vm1170_vm1, %v1629_v9  ;;  %v1630_v2 = vld [vmem:[%s2723_s28 + $0x18] sm:$0xff] }
 0x168   : > { %v1514_v61 = vsel %vm1170_vm1, %v1167_v32, -inf  ;;  %v1603_v22 = vsel %vm1579_vm6, %v1440_v54, %v1602_v0  ;;  %v1309_v33 = vrot.slane %v2634_v55, 4  ;;  %v1257_v10 = vrot.slane %v1256_v60, 2 }
 0x169   : > { %v1515_v51 = vmax.f32 %v1513_v11, %v1514_v61  ;;  %v1604_v56 = vsel %vm1581_vm7, %v1449_v59, %v1603_v22  ;;  %v1283_v14 = vmax.f32 %v2556_v25, %v1282_v57  ;;  %v1292_v45 = vmax.f32 %v2588_v16, %v1291_v39  ;;  %v1631_v39 = vld [vmem:[%s2723_s28 + $0x20] sm:$0xff] }
 0x16a   : > { %v2891_v18 = vsel %vm1583_vm8, %v1458_v26, %v1604_v56  ;;  %v1248_v21 = vrot.slane %v1247_v37, 2  ;;  %v1261_v44 = vsel %vm1170_vm1, %v1110_v5, -inf  ;;  %v1301_v20 = vmax.f32 %v2611_v1, %v1300_v3 }
 0x16b   : > { %v1516_v35 = vrot.slane %v1515_v51, 4  ;;  %v1084_v38 = vpop.f32.mrf.mxu3  ;;  %1621 = vst.msk [vmem:[%s2809_s20 + $0x18] sm:$0xff] %vm1170_vm1, %v2891_v18  ;;  %v1275_v29 = vrot.slane %v1274_v27, 2  ;;  %v1310_v24 = vmax.f32 %v2634_v55, %v1309_v33  ;;  %v1258_v31 = vmax.f32 %v1256_v60, %v1257_v10 }
 0x16c   : > { %v913_v19 = vpop.f32.mrf.mxu0  ;;  %v1085_v7 = vadd.f32 %v2822_v15, %v1084_v38  ;;  %v1284_v25 = vrot.slane %v1283_v14, 2  ;;  %v1293_v62 = vrot.slane %v1292_v45, 2  ;;  %v1249_v40 = vmax.f32 %v1247_v37, %v1248_v21 }
 0x16d   : > { %v1517_v49 = vmax.f32 %v1515_v51, %v1516_v35  ;;  %v914_v6 = vadd.f32 %v2822_v15, %v913_v19  ;;  %v1302_v30 = vrot.slane %v1301_v20, 2  ;;  %v1276_v52 = vmax.f32 %v1274_v27, %v1275_v29 }
 0x16e   : > { %v1168_v4 = vmax.f32 %v1085_v7, 0.0  ;;  %v1311_v54 = vrot.slane %v1310_v24, 2  ;;  %v1259_v11 = vrot.slane %v1258_v31, 1  ;;  %v1285_v32 = vmax.f32 %v1283_v14, %v1284_v25 }
 0x16f   : > { %v1518_v48 = vrot.slane %v1517_v49, 2  ;;  %v1111_v13 = vmax.f32 %v914_v6, 0.0  ;;  %2043 = vmatmul.msk.f32.gmra.mxu1 %vm1170_vm1, %v1630_v2  ;;  %v1294_v43 = vmax.f32 %v1292_v45, %v1293_v62  ;;  %v1250_v59 = vrot.slane %v1249_v40, 1 }
 0x170   : > { %v1522_v47 = vsel %vm1170_vm1, %v1168_v4, -inf  ;;  %v1303_v61 = vmax.f32 %v1301_v20, %v1302_v30  ;;  %v1277_v22 = vrot.slane %v1276_v52, 1  ;;  %v1312_v12 = vmax.f32 %v1310_v24, %v1311_v54  ;;  %v2138_v20 = vld [vmem:[%s480_s16] ss:$0 sm:$0xff] }
 0x171   : > { %v1519_v63 = vmax.f32 %v1517_v49, %v1518_v48  ;;  %v1262_v42 = vsel %vm1170_vm1, %v1111_v13, -inf  ;;  %v1260_v51 = vmax.f32 %v1258_v31, %v1259_v11  ;;  %v1286_v56 = vrot.slane %v1285_v32, 1  ;;  %v2139_v24 = vld [vmem:[%s483_s24] ss:$0 sm:$0xff] }
 0x172   : > { %v1263_v28 = vmax.f32 %v1261_v44, %v1262_v42  ;;  %v1295_v60 = vrot.slane %v1294_v43, 1  ;;  %v1251_v35 = vmax.f32 %v1249_v40, %v1250_v59  ;;  %v1278_v19 = vmax.f32 %v1276_v52, %v1277_v22 }
 0x173   : > { %v1520_v34 = vrot.slane %v1519_v63, 1  ;;  %v1087_v58 = vpop.f32.mrf.mxu3  ;;  %v1313_v5 = vrot.slane %v1312_v12, 1  ;;  %v1287_v6 = vmax.f32 %v1285_v32, %v1286_v56 }
 0x174   : > { %v1264_v53 = vrot.slane %v1263_v28, 4  ;;  %v1088_v16 = vadd.f32 %v2822_v15, %v1087_v58  ;;  %v1585_v37 = vsel %vm1571_vm2, %v1260_v51, %v1251_v35  ;;  %v1296_v3 = vmax.f32 %v1294_v43, %v1295_v60 }
 0x175   : > { %v1521_v41 = vmax.f32 %v1519_v63, %v1520_v34  ;;  %v1314_v48 = vmax.f32 %v1312_v12, %v1313_v5 }
 0x176   : > { %v1265_v1 = vmax.f32 %v1263_v28, %v1264_v53  ;;  %v1169_v50 = vmax.f32 %v1088_v16, 0.0 }
 0x177   : > { %v1611_v55 = vsel %vm1581_vm7, %v1521_v41, %v1610_v17  ;;  %v1304_v17 = vrot.slane %v1303_v61, 1  ;;  %2044 = vmatmul.msk.f32.gmra.mxu1 %vm1170_vm1, %v1631_v39 }
 0x178   : > { %v1266_v23 = vrot.slane %v1265_v1, 2  ;;  %v1523_v15 = vsel %vm1170_vm1, %v1169_v50, -inf }
 0x179   : > { %v1524_v0 = vmax.f32 %v1522_v47, %v1523_v15  ;;  %v1305_v33 = vmax.f32 %v1303_v61, %v1304_v17 }
 0x17a   : > { %v1267_v26 = vmax.f32 %v1265_v1, %v1266_v23 }
 0x17b   : > { %v1525_v8 = vrot.slane %v1524_v0, 4 }
 0x17c   : > { %v1268_v46 = vrot.slane %v1267_v26, 1 }
 0x17d   : > { %v1526_v38 = vmax.f32 %v1524_v0, %v1525_v8 }
 0x17e   : > { %v1269_v57 = vmax.f32 %v1267_v26, %v1268_v46 }
 0x17f   : > { %v1527_v49 = vrot.slane %v1526_v38, 2 }
 0x180   : > { %v1586_v27 = vsel %vm1573_vm3, %v1269_v57, %v1585_v37 }
 0x181   : > { %v1528_v7 = vmax.f32 %v1526_v38, %v1527_v49  ;;  %v1587_v9 = vsel %vm1575_vm4, %v1278_v19, %v1586_v27 }
 0x182   : > { %v1588_v10 = vsel %vm1577_vm5, %v1287_v6, %v1587_v9 }
 0x183   : > { %v1589_v13 = vsel %vm1579_vm6, %v1296_v3, %v1588_v10  ;;  %v1529_v14 = vrot.slane %v1528_v7, 1 }
 0x184   : > { %v1590_v45 = vsel %vm1581_vm7, %v1305_v33, %v1589_v13 }
 0x185   : > { %v1591_v21 = vsel %vm1583_vm8, %v1314_v48, %v1590_v45  ;;  %v1530_v63 = vmax.f32 %v1528_v7, %v1529_v14 }
 0x186   : > { %1619 = vst.msk [vmem:[%s2809_s20 + $0x8] sm:$0xff] %vm1170_vm1, %v1591_v21  ;;  %2046 = vmatmul.msk.f32.gmra.mxu2 %vm1170_vm1, %v1591_v21 }
 0x187   : > { %v1612_v44 = vsel %vm1583_vm8, %v1530_v63, %v1611_v55 }
 0x188   : > { %1622 = vst.msk [vmem:[%s2809_s20 + $0x20] sm:$0xff] %vm1170_vm1, %v1612_v44 }
 0x18e   : > { %2047 = vmatmul.msk.f32.gmra.mxu2 %vm1170_vm1, %v2867_v36 }
 0x196   : > { %2048 = vmatmul.msk.f32.gmra.mxu2 %vm1170_vm1, %v2891_v18 }
 0x19e   : > { %2049 = vmatmul.msk.f32.gmra.mxu2 %vm1170_vm1, %v1612_v44 }
 0x1ad   : > { %v1668_v42 = vpop.f32.mrf.mxu1 }
 0x1d4   : > { %v1710_v4 = vpop.f32.mrf.mxu2 }
 0x1d5   : > { %v1711_v28 = vadd.f32 %v1710_v4, %v1668_v42 }
 0x1d7   : > { %v1729_v29 = vadd.f32 %v2138_v20, %v1711_v28 }
 0x1d9   : > { %v1734_v36 = vmax.f32 %v1729_v29, 0.0 }
 0x1db   : > { %v1743_v31 = vmul.f32 %v2139_v24, %v1734_v36 }
 0x1dc   : > { %v1671_v34 = vpop.f32.mrf.mxu1 }
 0x1dd   : > { %v1748_v18 = vsel %vm1170_vm1, %v1743_v31, 0.0 }
 0x1de   : > { %1749 = vadd.xlane.f32.xlu0 %v1748_v18 }
 0x1e4   : > { %v1674_v53 = vpop.f32.mrf.mxu1 }
 0x1ec   : > { %v1677_v50 = vpop.f32.mrf.mxu1 }
 0x1f4   : > { %v1680_v15 = vpop.f32.mrf.mxu1 }
 0x209   : > { %v1713_v58 = vpop.f32.mrf.mxu2 }
 0x20a   : > { %v1714_v25 = vadd.f32 %v1713_v58, %v1671_v34 }
 0x20c   : > { %v1730_v16 = vadd.f32 %v2138_v20, %v1714_v25 }
 0x20e   : > { %v1735_v62 = vmax.f32 %v1730_v16, 0.0 }
 0x210   : > { %v1744_v40 = vmul.f32 %v2139_v24, %v1735_v62 }
 0x211   : > { %v1716_v41 = vpop.f32.mrf.mxu2 }
 0x212   : > { %v1717_v30 = vadd.f32 %v1716_v41, %v1674_v53  ;;  %v1751_v47 = vsel %vm1170_vm1, %v1744_v40, 0.0 }
 0x213   : > { %1752 = vadd.xlane.f32.xlu0 %v1751_v47 }
 0x214   : > { %v1731_v1 = vadd.f32 %v2138_v20, %v1717_v30 }
 0x216   : > { %v1736_v2 = vmax.f32 %v1731_v1, 0.0 }
 0x218   : > { %v1745_v52 = vmul.f32 %v2139_v24, %v1736_v2 }
 0x219   : > { %v1719_v54 = vpop.f32.mrf.mxu2 }
 0x21a   : > { %v1720_v11 = vadd.f32 %v1719_v54, %v1677_v50  ;;  %v1754_v55 = vsel %vm1170_vm1, %v1745_v52, 0.0 }
 0x21b   : > { %1755 = vadd.xlane.f32.xlu1 %v1754_v55 }
 0x21c   : > { %v1732_v32 = vadd.f32 %v2138_v20, %v1720_v11 }
 0x21e   : > { %v1737_v23 = vmax.f32 %v1732_v32, 0.0 }
 0x220   : > { %v1746_v43 = vmul.f32 %v2139_v24, %v1737_v23 }
 0x221   : > { %v1722_v59 = vpop.f32.mrf.mxu2 }
 0x222   : > { %v1723_v0 = vadd.f32 %v1722_v59, %v1680_v15  ;;  %v1757_v61 = vsel %vm1170_vm1, %v1746_v43, 0.0 }
 0x223   : > { %1758 = vadd.xlane.f32.xlu1 %v1757_v61 }
 0x224   : > { %v1733_v26 = vadd.f32 %v2138_v20, %v1723_v0 }
 0x226   : > { %v1738_v22 = vmax.f32 %v1733_v26, 0.0 }
 0x228   : > { %v1747_v12 = vmul.f32 %v2139_v24, %v1738_v22 }
 0x22a   : > { %v1760_v51 = vsel %vm1170_vm1, %v1747_v12, 0.0 }
 0x22b   : > { %1761 = vadd.xlane.f32.xlu2 %v1760_v51 }
 0x251   : > { %v1750_v8 = vpop.xlane.xlu0 %1749 }
 0x252   : > { %1764 = vst.msk [vmem:[%s494_s27] sm:$0xff] %vm1763_vm9, %v1750_v8 }
 0x286   : > { %v1753_v56 = vpop.xlane.xlu0 %1752 }
 0x287   : > { %1765 = vst.msk [vmem:[%s494_s27 + $0x8] sm:$0xff] %vm1763_vm9, %v1753_v56 }
 0x28e   : > { %v1756_v46 = vpop.xlane.xlu1 %1755 }
 0x28f   : > { %1766 = vst.msk [vmem:[%s494_s27 + $0x10] sm:$0xff] %vm1763_vm9, %v1756_v46 }
 0x296   : > { %v1759_v60 = vpop.xlane.xlu1 %1758 }
 0x297   : > { %1767 = vst.msk [vmem:[%s494_s27 + $0x18] sm:$0xff] %vm1763_vm9, %v1759_v60 }
 0x29e   : > { %v1762_v35 = vpop.xlane.xlu2 %1761 }
 0x29f   : > { %1768 = vst.msk [vmem:[%s494_s27 + $0x20] sm:$0xff] %vm1763_vm9, %v1762_v35 }
 0x2a0 PF: > { %s2983_s28 = sld [smem:[#allocation5_spill]]  ;;  %p20_p8 = scmp.ge.s32.totalorder %s2281_s14, 4  }
 0x2a1   : > { %s2984_s30 = smov %s2197_s10  ;;  %s2985_s10 = smov %s2201_s11 }
 0x2a2   : > { %s2987_s12 = smov %s2281_s14  ;;  %22 = sbr.rel (!%p20_p8) target bundleno = 3 (0x3), region = 125 }
 0x2a6   : > { %s2986_s11 = smov %s2983_s28 }
 0x2a7   :  { %1808 = vsyncpa [#allocation3], 1 }
 0x2a8   :  { %1810 = vsyncpa [#allocation3 + $0x1], 1 }

</bundles_post_ra>
